<compile_context>
chip_gen: v7x
topology: tpu7x:2x2x1
jax: 0.10.0
libtpu: 0.0.40
codegen_flags: <defaults>
</compile_context>

<pallas_src>
import functools

import jax
import jax.numpy as jnp
import numpy as np
from jax.experimental import pallas as pl
from jax.experimental.pallas import tpu as pltpu


_VMEM_LIMIT = 32 * 1024 * 1024  # fits the default scoped limit on v5e/v6e/v7x


def _round_up(x, m):
    return ((x + m - 1) // m) * m


# ----------------------------------------------------------------------------
# ConvTranspose2d(Cin, Cout, kernel=2, stride=2): with stride == kernel the output
# 2x2 blocks do not overlap, so it is exactly one matmul
#   y[b, 2h+i, 2w+j, o] = sum_c x[b,h,w,c] * W[c,o,i,j] + bias[o]
# The matmul (+bias) is a gridded Pallas kernel; the 2x2 block scatter is glue.
# ----------------------------------------------------------------------------
def _deconv_kernel(x_ref, w_ref, b_ref, o_ref):
    # x_ref: (tm, Cin) bf16, w_ref: (Cin, 4*Cout) bf16, b_ref: (1, 4*Cout) f32
    acc = jnp.dot(x_ref[...], w_ref[...], preferred_element_type=jnp.float32)
    o_ref[...] = (acc + b_ref[...]).astype(o_ref.dtype)


def deconv2x2_stride2(x_nhwc, w_up, b_up, *, tm=512):
    """nn.ConvTranspose2d(Cin, Cout, 2, stride=2) in NHWC."""
    B, H, W, Cin = x_nhwc.shape
    Cout = w_up.shape[1]
    M = B * H * W
    tm = min(tm, _round_up(M, 8))
    M_pad = _round_up(M, tm)

    x_flat = x_nhwc.reshape(M, Cin)
    if M_pad != M:
        x_flat = jnp.pad(x_flat, ((0, M_pad - M), (0, 0)))
    x_flat = x_flat.astype(jnp.bfloat16)
    # weight columns ordered (di, dj, o)
    w_flat = jnp.transpose(w_up, (0, 2, 3, 1)).reshape(Cin, 4 * Cout).astype(jnp.bfloat16)
    b_flat = jnp.tile(b_up, 4).reshape(1, 4 * Cout).astype(jnp.float32)

    out = pl.pallas_call(
        _deconv_kernel,
        out_shape=jax.ShapeDtypeStruct((M_pad, 4 * Cout), jnp.float32),
        grid=(M_pad // tm,),
        in_specs=[
            pl.BlockSpec((tm, Cin), lambda i: (i, 0)),
            pl.BlockSpec((Cin, 4 * Cout), lambda i: (0, 0)),
            pl.BlockSpec((1, 4 * Cout), lambda i: (0, 0)),
        ],
        out_specs=pl.BlockSpec((tm, 4 * Cout), lambda i: (i, 0)),
        compiler_params=pltpu.CompilerParams(
            dimension_semantics=("parallel",), vmem_limit_bytes=_VMEM_LIMIT),
    )(x_flat, w_flat, b_flat)

    out = out[:M].reshape(B, H, W, 2, 2, Cout)          # (..., di, dj, o)
    up = jnp.transpose(out, (0, 1, 3, 2, 4, 5)).reshape(B, 2 * H, 2 * W, Cout)
    return up


# ----------------------------------------------------------------------------
# Fused Conv3x3(pad=1)+ReLU -> Conv3x3(pad=1)+ReLU in ONE pallas_call per image.
#
# conv1 is a single (Hq*Wp, 9*Cc) @ (9*Cc, Cout) matmul over an im2col built in glue
# on the *padded* output grid (Hq = H+3, Wp = W+2 rows/cols, row-major flat layout);
# a precomputed mask zeroes the padding ring so the flat array directly is conv2's
# zero-padded input.  conv2 then needs only 9 contiguous row-range slices of that flat
# array (offset di*Wp + dj), each a whole-image matmul -- no per-row loops, no 3-D
# reshapes inside the kernel.
# ----------------------------------------------------------------------------
def _fused_conv_kernel(p_ref, mask_ref, w1_ref, b1_ref, w2_ref, b2_ref, o_ref, h1_ref,
                       *, wp, n_out):
    # p_ref:   (1, Hq*Wp, 9*Cc)  bf16   im2col patches of concat([up, crop]) (padded grid)
    # mask_ref:(Hq*Wp, 1)        f32    1.0 on the interior, 0.0 on the padding ring
    # w1_ref:  (9*Cc, Cout)      bf16
    # w2_ref:  (9, Cout, Cout)   bf16   taps ordered t = di*3 + dj
    # o_ref:   (1, H*Wp, Cout)   f32    (columns >= W are discarded in glue)
    # h1_ref:  (Hq*Wp, Cout)     bf16   VMEM scratch: conv1 activation, flat & zero-padded
    cout = o_ref.shape[-1]

    # conv1: one big matmul, K = 9*Cin, f32 accumulation; epilogue in f32.
    h1 = jnp.dot(p_ref[0], w1_ref[...], preferred_element_type=jnp.float32)
    h1 = jnp.maximum(h1 + b1_ref[...], 0.0) * mask_ref[...]
    h1_ref[...] = h1.astype(h1_ref.dtype)

    # conv2: 9 whole-image shifted taps on the flat row-major (width-padded) layout.
    acc = jnp.zeros((n_out, cout), jnp.float32)
    for t in range(9):
        di, dj = divmod(t, 3)
        off = di * wp + dj
        acc = acc + jnp.dot(h1_ref[pl.ds(off, n_out), :], w2_ref[t],
                            preferred_element_type=jnp.float32)
    o_ref[0] = jnp.maximum(acc + b2_ref[...], 0.0).astype(o_ref.dtype)


def fused_double_conv(x_nhwc, w1_oihw, b1, w2_oihw, b2):
    """ReLU(conv2(ReLU(conv1(x)))) with 3x3/pad=1 convs, fused into one kernel."""
    B, H, W, Cc = x_nhwc.shape
    Cout = w1_oihw.shape[0]
    Wp = W + 2            # width-padded row length (conv2's left/right zero pad)
    Hq = H + 3            # 1 top pad + H rows + 2 bottom pads (keeps all tap slices in range)
    n_pos = Hq * Wp       # conv1 is evaluated on the whole padded grid (ring masked to 0)
    n_out = H * Wp        # conv2 output rows computed (junk columns >= W dropped in glue)

    # im2col on the padded grid: position (r', s') tap (di, dj) reads cat[r'+di-2, s'+dj-2].
    xp = jnp.pad(x_nhwc, ((0, 0), (2, 3), (2, 2), (0, 0)))
    patches = jnp.concatenate(
        [xp[:, di:di + Hq, dj:dj + Wp, :] for di in range(3) for dj in range(3)],
        axis=-1).reshape(B, n_pos, 9 * Cc).astype(jnp.bfloat16)

    # interior mask (rows 1..H, cols 1..W of the (Hq, Wp) grid).
    rr = np.arange(n_pos) // Wp
    ss = np.arange(n_pos) % Wp
    mask = ((rr >= 1) & (rr <= H) & (ss >= 1) & (ss <= W)).astype(np.float32)
    mask = jnp.asarray(mask).reshape(n_pos, 1)

    # weights: (Cout, Cin, 3, 3) -> tap-major layouts matching the im2col / tap loop.
    w1_flat = jnp.transpose(w1_oihw, (2, 3, 1, 0)).reshape(9 * Cc, Cout).astype(jnp.bfloat16)
    w2_taps = jnp.transpose(w2_oihw, (2, 3, 1, 0)).reshape(9, Cout, Cout).astype(jnp.bfloat16)

    kernel = functools.partial(_fused_conv_kernel, wp=Wp, n_out=n_out)
    out = pl.pallas_call(
        kernel,
        out_shape=jax.ShapeDtypeStruct((B, n_out, Cout), jnp.float32),
        grid=(B,),
        in_specs=[
            pl.BlockSpec((1, n_pos, 9 * Cc), lambda b: (b, 0, 0)),
            pl.BlockSpec((n_pos, 1), lambda b: (0, 0)),
            pl.BlockSpec((9 * Cc, Cout), lambda b: (0, 0)),
            pl.BlockSpec((1, Cout), lambda b: (0, 0)),
            pl.BlockSpec((9, Cout, Cout), lambda b: (0, 0, 0)),
            pl.BlockSpec((1, Cout), lambda b: (0, 0)),
        ],
        out_specs=pl.BlockSpec((1, n_out, Cout), lambda b: (b, 0, 0)),
        scratch_shapes=[pltpu.VMEM((n_pos, Cout), jnp.bfloat16)],
        compiler_params=pltpu.CompilerParams(
            dimension_semantics=("parallel",), vmem_limit_bytes=_VMEM_LIMIT),
    )(patches, mask, w1_flat, b1.reshape(1, Cout).astype(jnp.float32),
      w2_taps, b2.reshape(1, Cout).astype(jnp.float32))

    # drop the 2 junk (padding) columns of each width-padded row.
    return out.reshape(B, H, Wp, Cout)[:, :, :W, :]


def center_crop_nhwc(layer, target_size):
    xy1 = (layer.shape[1] - target_size) // 2
    return layer[:, xy1:xy1 + target_size, xy1:xy1 + target_size, :]


# ----------------------------------------------------------------------------
# Full UNetUpBlock.forward
# ----------------------------------------------------------------------------
def unet_up_block_forward(x_nchw, bridge_nchw, params):
    x = jnp.transpose(x_nchw, (0, 2, 3, 1)).astype(jnp.float32)
    bridge = jnp.transpose(bridge_nchw, (0, 2, 3, 1)).astype(jnp.float32)

    up = deconv2x2_stride2(x, params["up_w"], params["up_b"])     # self.up(x)
    crop1 = center_crop_nhwc(bridge, up.shape[1])                 # center_crop(bridge, ...)
    cat = jnp.concatenate([up, crop1], axis=-1)                   # torch.cat(dim=1) -> NHWC last
    out = fused_double_conv(cat, params["conv_w"], params["conv_b"],
                            params["conv2_w"], params["conv2_b"])  # relu(conv) -> relu(conv2)
    return jnp.transpose(out, (0, 3, 1, 2))                       # back to NCHW


# ----------------------------------------------------------------------------
# Pure-JAX (XLA, f32 HIGHEST) reference for correctness checking
# ----------------------------------------------------------------------------
def reference_forward(x_nchw, bridge_nchw, params):
    x = jnp.transpose(x_nchw, (0, 2, 3, 1)).astype(jnp.float32)
    bridge = jnp.transpose(bridge_nchw, (0, 2, 3, 1)).astype(jnp.float32)
    B, H, W, _ = x.shape
    Cout = params["up_w"].shape[1]
    t = jnp.einsum("bhwc,coij->bhiwjo", x, params["up_w"],
                   precision=jax.lax.Precision.HIGHEST)
    up = t.reshape(B, 2 * H, 2 * W, Cout) + params["up_b"]
    crop1 = center_crop_nhwc(bridge, 2 * H)
    out = jnp.concatenate([up, crop1], axis=-1)
    dn = ("NHWC", "HWIO", "NHWC")
    for wk, bk in (("conv_w", "conv_b"), ("conv2_w", "conv2_b")):
        w_hwio = jnp.transpose(params[wk], (2, 3, 1, 0))
        out = jax.lax.conv_general_dilated(
            out, w_hwio, (1, 1), ((1, 1), (1, 1)), dimension_numbers=dn,
            precision=jax.lax.Precision.HIGHEST) + params[bk]
        out = jnp.maximum(out, 0.0)
    return jnp.transpose(out, (0, 3, 1, 2))


if __name__ == "__main__":
    in_size, out_size = 8, 4
    B, H, W = 2, 8, 8                     # x spatial -> upsampled output is 16x16

    key = jax.random.PRNGKey(0)
    ks = jax.random.split(key, 8)
    params = {
        # nn.ConvTranspose2d(in_size, out_size, 2, stride=2): weight (Cin, Cout, 2, 2)
        "up_w": 0.1 * jax.random.normal(ks[0], (in_size, out_size, 2, 2), jnp.float32),
        "up_b": 0.1 * jax.random.normal(ks[1], (out_size,), jnp.float32),
        # nn.Conv2d(in_size, out_size, 3, padding=1): weight (Cout, Cin, 3, 3)
        "conv_w": 0.1 * jax.random.normal(ks[2], (out_size, in_size, 3, 3), jnp.float32),
        "conv_b": 0.1 * jax.random.normal(ks[3], (out_size,), jnp.float32),
        # nn.Conv2d(out_size, out_size, 3, padding=1)
        "conv2_w": 0.1 * jax.random.normal(ks[4], (out_size, out_size, 3, 3), jnp.float32),
        "conv2_b": 0.1 * jax.random.normal(ks[5], (out_size,), jnp.float32),
    }

    # NCHW inputs (PyTorch convention). bridge has in_size - out_size channels so that
    # cat([up, crop], 1) has in_size channels, as self.conv requires.
    x = jax.random.normal(ks[6], (B, in_size, H, W), jnp.float32)
    bridge = jax.random.normal(ks[7], (B, in_size - out_size, 20, 20), jnp.float32)

    out = jax.jit(unet_up_block_forward)(x, bridge, params)
    out = jax.block_until_ready(out)

    # kernels use bf16 MXU operands (f32 accumulation) per the perf review, so compare
    # against the f32 reference with a tolerance that covers bf16 operand rounding.
    ref = reference_forward(x, bridge, params)
    np.testing.assert_allclose(np.asarray(out), np.asarray(ref), rtol=2e-2, atol=2e-2)
    assert out.shape == (B, out_size, 2 * H, 2 * W)
    print("KERNEL_OK")
</pallas_src>

<mosaic_0001>
module attributes {stable_mosaic.version = 11 : i64} {
  func.func @_deconv_kernel(%arg0: i32, %arg1: memref<128x8xbf16, #tpu.memory_space<vmem>>, %arg2: memref<8x16xbf16, #tpu.memory_space<vmem>>, %arg3: memref<1x16xf32, #tpu.memory_space<vmem>>, %arg4: memref<128x16xf32, #tpu.memory_space<vmem>>) attributes {dimension_semantics = [#tpu.dimension_semantics<parallel>], iteration_bounds = array<i64: 1>, scalar_prefetch = 0 : i64, scratch_operands = 0 : i64, tpu.core_type = #tpu.core_type<tc>, window_params = [{transform_indices = @transform_0, window_bounds = array<i64: 128, 8>}, {pipeline_mode = #tpu.pipeline_mode<synchronous>, transform_indices = @transform_1, window_bounds = array<i64: 8, 16>}, {pipeline_mode = #tpu.pipeline_mode<synchronous>, transform_indices = @transform_2, window_bounds = array<i64: 1, 16>}, {transform_indices = @transform_3, window_bounds = array<i64: 128, 16>}]} {
    %c0 = arith.constant 0 : index
    %c0_0 = arith.constant 0 : index
    %0 = vector.load %arg1[%c0, %c0_0] : memref<128x8xbf16, #tpu.memory_space<vmem>>, vector<128x8xbf16>
    %c0_1 = arith.constant 0 : index
    %c0_2 = arith.constant 0 : index
    %1 = vector.load %arg2[%c0_1, %c0_2] : memref<8x16xbf16, #tpu.memory_space<vmem>>, vector<8x16xbf16>
    %cst = arith.constant dense<0.000000e+00> : vector<128x16xf32>
    %2 = tpu.matmul %0, %1, %cst {dimension_numbers = #tpu.dot_dimension_numbers<[1], [0], [0], [1], [0, 0, 1, 1], [], []>} : vector<128x8xbf16>, vector<8x16xbf16>, vector<128x16xf32> -> vector<128x16xf32>
    %c0_3 = arith.constant 0 : index
    %c0_4 = arith.constant 0 : index
    %3 = vector.load %arg3[%c0_3, %c0_4] : memref<1x16xf32, #tpu.memory_space<vmem>>, vector<1x16xf32>
    %4 = vector.broadcast %3 : vector<1x16xf32> to vector<128x16xf32>
    %5 = arith.addf %2, %4 : vector<128x16xf32>
    %c0_5 = arith.constant 0 : index
    %c0_6 = arith.constant 0 : index
    %6 = vector.load %arg4[%c0_5, %c0_6] : memref<128x16xf32, #tpu.memory_space<vmem>>, vector<128x16xf32>
    tpu.vector_store %arg4[%c0_5, %c0_6], %5 {strides = array<i32>} : memref<128x16xf32, #tpu.memory_space<vmem>>, vector<128x16xf32>,
    return
  }
  func.func @transform_0(%arg0: i32) -> (i32, i32) {
    %c0_i32 = arith.constant 0 : i32
    %c0_i32_0 = arith.constant 0 : i32
    return %arg0, %c0_i32 : i32, i32
  }
  func.func @transform_1(%arg0: i32) -> (i32, i32) {
    %c0_i32 = arith.constant 0 : i32
    %c0_i32_0 = arith.constant 0 : i32
    %c0_i32_1 = arith.constant 0 : i32
    return %c0_i32, %c0_i32_0 : i32, i32
  }
  func.func @transform_2(%arg0: i32) -> (i32, i32) {
    %c0_i32 = arith.constant 0 : i32
    %c0_i32_0 = arith.constant 0 : i32
    %c0_i32_1 = arith.constant 0 : i32
    return %c0_i32, %c0_i32_0 : i32, i32
  }
  func.func @transform_3(%arg0: i32) -> (i32, i32) {
    %c0_i32 = arith.constant 0 : i32
    %c0_i32_0 = arith.constant 0 : i32
    return %arg0, %c0_i32 : i32, i32
  }
}

module attributes {stable_mosaic.version = 11 : i64} {
  func.func @_fused_conv_kernel(%arg0: i32, %arg1: memref<1x342x72xbf16, #tpu.memory_space<vmem>>, %arg2: memref<342x1xf32, #tpu.memory_space<vmem>>, %arg3: memref<72x4xbf16, #tpu.memory_space<vmem>>, %arg4: memref<1x4xf32, #tpu.memory_space<vmem>>, %arg5: memref<9x4x4xbf16, #tpu.memory_space<vmem>>, %arg6: memref<1x4xf32, #tpu.memory_space<vmem>>, %arg7: memref<1x288x4xf32, #tpu.memory_space<vmem>>, %arg8: memref<342x4xbf16, #tpu.memory_space<vmem>>) attributes {dimension_semantics = [#tpu.dimension_semantics<parallel>], iteration_bounds = array<i64: 2>, scalar_prefetch = 0 : i64, scratch_operands = 1 : i64, tpu.core_type = #tpu.core_type<tc>, window_params = [{transform_indices = @transform_0, window_bounds = array<i64: 1, 342, 72>}, {pipeline_mode = #tpu.pipeline_mode<synchronous>, transform_indices = @transform_1, window_bounds = array<i64: 342, 1>}, {pipeline_mode = #tpu.pipeline_mode<synchronous>, transform_indices = @transform_2, window_bounds = array<i64: 72, 4>}, {pipeline_mode = #tpu.pipeline_mode<synchronous>, transform_indices = @transform_3, window_bounds = array<i64: 1, 4>}, {pipeline_mode = #tpu.pipeline_mode<synchronous>, transform_indices = @transform_4, window_bounds = array<i64: 9, 4, 4>}, {pipeline_mode = #tpu.pipeline_mode<synchronous>, transform_indices = @transform_5, window_bounds = array<i64: 1, 4>}, {transform_indices = @transform_6, window_bounds = array<i64: 1, 288, 4>}]} {
    %c0 = arith.constant 0 : index
    %c0_0 = arith.constant 0 : index
    %c0_1 = arith.constant 0 : index
    %0 = vector.load %arg1[%c0, %c0_0, %c0_1] : memref<1x342x72xbf16, #tpu.memory_space<vmem>>, vector<1x342x72xbf16>
    %1 = vector.shape_cast %0 : vector<1x342x72xbf16> to vector<342x72xbf16>
    %c0_2 = arith.constant 0 : index
    %c0_3 = arith.constant 0 : index
    %2 = vector.load %arg3[%c0_2, %c0_3] : memref<72x4xbf16, #tpu.memory_space<vmem>>, vector<72x4xbf16>
    %cst = arith.constant dense<0.000000e+00> : vector<342x4xf32>
    %3 = tpu.matmul %1, %2, %cst {dimension_numbers = #tpu.dot_dimension_numbers<[1], [0], [0], [1], [0, 0, 1, 1], [], []>} : vector<342x72xbf16>, vector<72x4xbf16>, vector<342x4xf32> -> vector<342x4xf32>
    %c0_4 = arith.constant 0 : index
    %c0_5 = arith.constant 0 : index
    %4 = vector.load %arg4[%c0_4, %c0_5] : memref<1x4xf32, #tpu.memory_space<vmem>>, vector<1x4xf32>
    %5 = vector.broadcast %4 : vector<1x4xf32> to vector<342x4xf32>
    %6 = arith.addf %3, %5 : vector<342x4xf32>
    %cst_6 = arith.constant 0.000000e+00 : f32
    %7 = vector.broadcast %cst_6 : f32 to vector<342x4xf32>
    %8 = arith.maximumf %6, %7 : vector<342x4xf32>
    %c0_7 = arith.constant 0 : index
    %c0_8 = arith.constant 0 : index
    %9 = vector.load %arg2[%c0_7, %c0_8] : memref<342x1xf32, #tpu.memory_space<vmem>>, vector<342x1xf32>
    %10 = vector.broadcast %9 : vector<342x1xf32> to vector<342x4xf32>
    %11 = arith.mulf %8, %10 : vector<342x4xf32>
    %12 = arith.truncf %11 : vector<342x4xf32> to vector<342x4xbf16>
    %c0_9 = arith.constant 0 : index
    %c0_10 = arith.constant 0 : index
    %13 = vector.load %arg8[%c0_9, %c0_10] : memref<342x4xbf16, #tpu.memory_space<vmem>>, vector<342x4xbf16>
    tpu.vector_store %arg8[%c0_9, %c0_10], %12 {strides = array<i32>} : memref<342x4xbf16, #tpu.memory_space<vmem>>, vector<342x4xbf16>,
    %cst_11 = arith.constant 0.000000e+00 : f32
    %14 = vector.broadcast %cst_11 : f32 to vector<288x4xf32>
    %c0_12 = arith.constant 0 : index
    %c0_13 = arith.constant 0 : index
    %15 = vector.load %arg8[%c0_12, %c0_13] : memref<342x4xbf16, #tpu.memory_space<vmem>>, vector<288x4xbf16>
    %c0_14 = arith.constant 0 : index
    %c0_15 = arith.constant 0 : index
    %c0_16 = arith.constant 0 : index
    %16 = vector.load %arg5[%c0_14, %c0_15, %c0_16] : memref<9x4x4xbf16, #tpu.memory_space<vmem>>, vector<1x4x4xbf16>
    %17 = vector.shape_cast %16 : vector<1x4x4xbf16> to vector<4x4xbf16>
    %cst_17 = arith.constant dense<0.000000e+00> : vector<288x4xf32>
    %18 = tpu.matmul %15, %17, %cst_17 {dimension_numbers = #tpu.dot_dimension_numbers<[1], [0], [0], [1], [0, 0, 1, 1], [], []>} : vector<288x4xbf16>, vector<4x4xbf16>, vector<288x4xf32> -> vector<288x4xf32>
    %19 = arith.addf %14, %18 : vector<288x4xf32>
    %c1 = arith.constant 1 : index
    %c0_18 = arith.constant 0 : index
    %20 = vector.load %arg8[%c1, %c0_18] : memref<342x4xbf16, #tpu.memory_space<vmem>>, vector<288x4xbf16>
    %c1_19 = arith.constant 1 : index
    %c0_20 = arith.constant 0 : index
    %c0_21 = arith.constant 0 : index
    %21 = vector.load %arg5[%c1_19, %c0_20, %c0_21] : memref<9x4x4xbf16, #tpu.memory_space<vmem>>, vector<1x4x4xbf16>
    %22 = vector.shape_cast %21 : vector<1x4x4xbf16> to vector<4x4xbf16>
    %cst_22 = arith.constant dense<0.000000e+00> : vector<288x4xf32>
    %23 = tpu.matmul %20, %22, %cst_22 {dimension_numbers = #tpu.dot_dimension_numbers<[1], [0], [0], [1], [0, 0, 1, 1], [], []>} : vector<288x4xbf16>, vector<4x4xbf16>, vector<288x4xf32> -> vector<288x4xf32>
    %24 = arith.addf %19, %23 : vector<288x4xf32>
    %c2 = arith.constant 2 : index
    %c0_23 = arith.constant 0 : index
    %25 = vector.load %arg8[%c2, %c0_23] : memref<342x4xbf16, #tpu.memory_space<vmem>>, vector<288x4xbf16>
    %c2_24 = arith.constant 2 : index
    %c0_25 = arith.constant 0 : index
    %c0_26 = arith.constant 0 : index
    %26 = vector.load %arg5[%c2_24, %c0_25, %c0_26] : memref<9x4x4xbf16, #tpu.memory_space<vmem>>, vector<1x4x4xbf16>
    %27 = vector.shape_cast %26 : vector<1x4x4xbf16> to vector<4x4xbf16>
    %cst_27 = arith.constant dense<0.000000e+00> : vector<288x4xf32>
    %28 = tpu.matmul %25, %27, %cst_27 {dimension_numbers = #tpu.dot_dimension_numbers<[1], [0], [0], [1], [0, 0, 1, 1], [], []>} : vector<288x4xbf16>, vector<4x4xbf16>, vector<288x4xf32> -> vector<288x4xf32>
    %29 = arith.addf %24, %28 : vector<288x4xf32>
    %c18 = arith.constant 18 : index
    %c0_28 = arith.constant 0 : index
    %30 = vector.load %arg8[%c18, %c0_28] : memref<342x4xbf16, #tpu.memory_space<vmem>>, vector<288x4xbf16>
    %c3 = arith.constant 3 : index
    %c0_29 = arith.constant 0 : index
    %c0_30 = arith.constant 0 : index
    %31 = vector.load %arg5[%c3, %c0_29, %c0_30] : memref<9x4x4xbf16, #tpu.memory_space<vmem>>, vector<1x4x4xbf16>
    %32 = vector.shape_cast %31 : vector<1x4x4xbf16> to vector<4x4xbf16>
    %cst_31 = arith.constant dense<0.000000e+00> : vector<288x4xf32>
    %33 = tpu.matmul %30, %32, %cst_31 {dimension_numbers = #tpu.dot_dimension_numbers<[1], [0], [0], [1], [0, 0, 1, 1], [], []>} : vector<288x4xbf16>, vector<4x4xbf16>, vector<288x4xf32> -> vector<288x4xf32>
    %34 = arith.addf %29, %33 : vector<288x4xf32>
    %c19 = arith.constant 19 : index
    %c0_32 = arith.constant 0 : index
    %35 = vector.load %arg8[%c19, %c0_32] : memref<342x4xbf16, #tpu.memory_space<vmem>>, vector<288x4xbf16>
    %c4 = arith.constant 4 : index
    %c0_33 = arith.constant 0 : index
    %c0_34 = arith.constant 0 : index
    %36 = vector.load %arg5[%c4, %c0_33, %c0_34] : memref<9x4x4xbf16, #tpu.memory_space<vmem>>, vector<1x4x4xbf16>
    %37 = vector.shape_cast %36 : vector<1x4x4xbf16> to vector<4x4xbf16>
    %cst_35 = arith.constant dense<0.000000e+00> : vector<288x4xf32>
    %38 = tpu.matmul %35, %37, %cst_35 {dimension_numbers = #tpu.dot_dimension_numbers<[1], [0], [0], [1], [0, 0, 1, 1], [], []>} : vector<288x4xbf16>, vector<4x4xbf16>, vector<288x4xf32> -> vector<288x4xf32>
    %39 = arith.addf %34, %38 : vector<288x4xf32>
    %c20 = arith.constant 20 : index
    %c0_36 = arith.constant 0 : index
    %40 = vector.load %arg8[%c20, %c0_36] : memref<342x4xbf16, #tpu.memory_space<vmem>>, vector<288x4xbf16>
    %c5 = arith.constant 5 : index
    %c0_37 = arith.constant 0 : index
    %c0_38 = arith.constant 0 : index
    %41 = vector.load %arg5[%c5, %c0_37, %c0_38] : memref<9x4x4xbf16, #tpu.memory_space<vmem>>, vector<1x4x4xbf16>
    %42 = vector.shape_cast %41 : vector<1x4x4xbf16> to vector<4x4xbf16>
    %cst_39 = arith.constant dense<0.000000e+00> : vector<288x4xf32>
    %43 = tpu.matmul %40, %42, %cst_39 {dimension_numbers = #tpu.dot_dimension_numbers<[1], [0], [0], [1], [0, 0, 1, 1], [], []>} : vector<288x4xbf16>, vector<4x4xbf16>, vector<288x4xf32> -> vector<288x4xf32>
    %44 = arith.addf %39, %43 : vector<288x4xf32>
    %c36 = arith.constant 36 : index
    %c0_40 = arith.constant 0 : index
    %45 = vector.load %arg8[%c36, %c0_40] : memref<342x4xbf16, #tpu.memory_space<vmem>>, vector<288x4xbf16>
    %c6 = arith.constant 6 : index
    %c0_41 = arith.constant 0 : index
    %c0_42 = arith.constant 0 : index
    %46 = vector.load %arg5[%c6, %c0_41, %c0_42] : memref<9x4x4xbf16, #tpu.memory_space<vmem>>, vector<1x4x4xbf16>
    %47 = vector.shape_cast %46 : vector<1x4x4xbf16> to vector<4x4xbf16>
    %cst_43 = arith.constant dense<0.000000e+00> : vector<288x4xf32>
    %48 = tpu.matmul %45, %47, %cst_43 {dimension_numbers = #tpu.dot_dimension_numbers<[1], [0], [0], [1], [0, 0, 1, 1], [], []>} : vector<288x4xbf16>, vector<4x4xbf16>, vector<288x4xf32> -> vector<288x4xf32>
    %49 = arith.addf %44, %48 : vector<288x4xf32>
    %c37 = arith.constant 37 : index
    %c0_44 = arith.constant 0 : index
    %50 = vector.load %arg8[%c37, %c0_44] : memref<342x4xbf16, #tpu.memory_space<vmem>>, vector<288x4xbf16>
    %c7 = arith.constant 7 : index
    %c0_45 = arith.constant 0 : index
    %c0_46 = arith.constant 0 : index
    %51 = vector.load %arg5[%c7, %c0_45, %c0_46] : memref<9x4x4xbf16, #tpu.memory_space<vmem>>, vector<1x4x4xbf16>
    %52 = vector.shape_cast %51 : vector<1x4x4xbf16> to vector<4x4xbf16>
    %cst_47 = arith.constant dense<0.000000e+00> : vector<288x4xf32>
    %53 = tpu.matmul %50, %52, %cst_47 {dimension_numbers = #tpu.dot_dimension_numbers<[1], [0], [0], [1], [0, 0, 1, 1], [], []>} : vector<288x4xbf16>, vector<4x4xbf16>, vector<288x4xf32> -> vector<288x4xf32>
    %54 = arith.addf %49, %53 : vector<288x4xf32>
    %c38 = arith.constant 38 : index
    %c0_48 = arith.constant 0 : index
    %55 = vector.load %arg8[%c38, %c0_48] : memref<342x4xbf16, #tpu.memory_space<vmem>>, vector<288x4xbf16>
    %c8 = arith.constant 8 : index
    %c0_49 = arith.constant 0 : index
    %c0_50 = arith.constant 0 : index
    %56 = vector.load %arg5[%c8, %c0_49, %c0_50] : memref<9x4x4xbf16, #tpu.memory_space<vmem>>, vector<1x4x4xbf16>
    %57 = vector.shape_cast %56 : vector<1x4x4xbf16> to vector<4x4xbf16>
    %cst_51 = arith.constant dense<0.000000e+00> : vector<288x4xf32>
    %58 = tpu.matmul %55, %57, %cst_51 {dimension_numbers = #tpu.dot_dimension_numbers<[1], [0], [0], [1], [0, 0, 1, 1], [], []>} : vector<288x4xbf16>, vector<4x4xbf16>, vector<288x4xf32> -> vector<288x4xf32>
    %59 = arith.addf %54, %58 : vector<288x4xf32>
    %c0_52 = arith.constant 0 : index
    %c0_53 = arith.constant 0 : index
    %60 = vector.load %arg6[%c0_52, %c0_53] : memref<1x4xf32, #tpu.memory_space<vmem>>, vector<1x4xf32>
    %61 = vector.broadcast %60 : vector<1x4xf32> to vector<288x4xf32>
    %62 = arith.addf %59, %61 : vector<288x4xf32>
    %cst_54 = arith.constant 0.000000e+00 : f32
    %63 = vector.broadcast %cst_54 : f32 to vector<288x4xf32>
    %64 = arith.maximumf %62, %63 : vector<288x4xf32>
    %c0_55 = arith.constant 0 : index
    %c0_56 = arith.constant 0 : index
    %c0_57 = arith.constant 0 : index
    %65 = vector.load %arg7[%c0_55, %c0_56, %c0_57] : memref<1x288x4xf32, #tpu.memory_space<vmem>>, vector<1x288x4xf32>
    %66 = vector.shape_cast %65 : vector<1x288x4xf32> to vector<288x4xf32>
    %67 = vector.shape_cast %64 : vector<288x4xf32> to vector<1x288x4xf32>
    tpu.vector_store %arg7[%c0_55, %c0_56, %c0_57], %67 {strides = array<i32>} : memref<1x288x4xf32, #tpu.memory_space<vmem>>, vector<1x288x4xf32>,
    return
  }
  func.func @transform_0(%arg0: i32) -> (i32, i32, i32) {
    %c0_i32 = arith.constant 0 : i32
    %c0_i32_0 = arith.constant 0 : i32
    %c0_i32_1 = arith.constant 0 : i32
    return %arg0, %c0_i32, %c0_i32_0 : i32, i32, i32
  }
  func.func @transform_1(%arg0: i32) -> (i32, i32) {
    %c0_i32 = arith.constant 0 : i32
    %c0_i32_0 = arith.constant 0 : i32
    %c0_i32_1 = arith.constant 0 : i32
    return %c0_i32, %c0_i32_0 : i32, i32
  }
  func.func @transform_2(%arg0: i32) -> (i32, i32) {
    %c0_i32 = arith.constant 0 : i32
    %c0_i32_0 = arith.constant 0 : i32
    %c0_i32_1 = arith.constant 0 : i32
    return %c0_i32, %c0_i32_0 : i32, i32
  }
  func.func @transform_3(%arg0: i32) -> (i32, i32) {
    %c0_i32 = arith.constant 0 : i32
    %c0_i32_0 = arith.constant 0 : i32
    %c0_i32_1 = arith.constant 0 : i32
    return %c0_i32, %c0_i32_0 : i32, i32
  }
  func.func @transform_4(%arg0: i32) -> (i32, i32, i32) {
    %c0_i32 = arith.constant 0 : i32
    %c0_i32_0 = arith.constant 0 : i32
    %c0_i32_1 = arith.constant 0 : i32
    %c0_i32_2 = arith.constant 0 : i32
    return %c0_i32, %c0_i32_0, %c0_i32_1 : i32, i32, i32
  }
  func.func @transform_5(%arg0: i32) -> (i32, i32) {
    %c0_i32 = arith.constant 0 : i32
    %c0_i32_0 = arith.constant 0 : i32
    %c0_i32_1 = arith.constant 0 : i32
    return %c0_i32, %c0_i32_0 : i32, i32
  }
  func.func @transform_6(%arg0: i32) -> (i32, i32, i32) {
    %c0_i32 = arith.constant 0 : i32
    %c0_i32_0 = arith.constant 0 : i32
    %c0_i32_1 = arith.constant 0 : i32
    return %arg0, %c0_i32, %c0_i32_0 : i32, i32, i32
  }
}

</mosaic_0001>

<bundles_post_ra>
// kernel: tile.8
= control target key start
LH: loop header
LB: loop body
LE: loop exit
PB: predicated region body
PF: predicated region fallthrough
CT: control target
= control target key end

     0   :  { %s22_s0 = inlined_call_operand.vmem [shape: f32[4], index: 0, kind: input, shape index: {}]   ;;  %s23_s1 = inlined_call_operand.vmem [shape: f32[4,4], index: 1, kind: output, shape index: {}]  }
   0x1   :  { %v4_v0 = vld [vmem:[%s22_s0] ss:$0 sm:$0xff] }
   0x2   :  { %5 = vst [vmem:[%s23_s1] sm:$0xf] %v4_v0 }

// kernel: tile.9
= control target key start
LH: loop header
LB: loop body
LE: loop exit
PB: predicated region body
PF: predicated region fallthrough
CT: control target
= control target key end

     0   :  { %vm7_vm0 = vcmask 31744   ;;  %s37_s8 = smov 4   ;;  %s38_s9 = smov 8   ;;  %vm13_vm1 = vcmask 130144   ;;  %vm19_vm2 = vcmask 97344   ;;  %vm25_vm3 = vcmask 64544   ;;  %s55_s0 = inlined_call_operand.vmem [shape: f32[4,4], index: 0, kind: input, shape index: {}]   ;;  %s56_s1 = inlined_call_operand.vmem [shape: f32[1,16], index: 1, kind: output, shape index: {}]  }
   0x1   :  { %v4_v0 = vld [vmem:[%s55_s0] sm:$0xf]  ;;  %s36_s0 = smov 12  }
   0x2   :  { %5 = vst [vmem:[#allocation1] sm:$0xf] %v4_v0 }
   0x9   :  { %v10_v1 = vld [vmem:[#allocation1 + $0x3] sm:$0x1]   ;;  %v22_v2 = vld [vmem:[#allocation1 + $0x1] sm:$0x1]   ;;  %v6_v3 = vld [vmem:[#allocation1] sm:$0x1]  }
   0xa   :  { %11 = vrot.lane.b32.xlu0 %v10_v1, %s36_s0  ;;  %23 = vrot.lane.b32.xlu1 %v22_v2, %s37_s8  ;;  %v16_v4 = vld [vmem:[#allocation1 + $0x2] sm:$0x1]   ;;  %8 = vst.msk [vmem:[#allocation0] sm:$0x1] %vm7_vm0, %v6_v3  }
   0xe   :  { %17 = vrot.lane.b32.xlu0 %v16_v4, %s38_s9 }
  0x7c   :  { %v12_v5 = vpop.permute.xlu0 %11   ;;  %v24_v6 = vpop.permute.xlu1 %23  }
  0x7d   :  { %14 = vst.msk [vmem:[#allocation0] sm:$0x1] %vm13_vm1, %v12_v5  }
  0x80   :  { %v18_v7 = vpop.permute.xlu0 %17  }
  0x81   :  { %20 = vst.msk [vmem:[#allocation0] sm:$0x1] %vm19_vm2, %v18_v7  }
  0x82   :  { %26 = vst.msk [vmem:[#allocation0] sm:$0x1] %vm25_vm3, %v24_v6  }
  0x89   :  { %v30_v8 = vld [vmem:[#allocation0] sm:$0x1] }
  0x8a   :  { %32 = vst [vmem:[%s56_s1] sm:$0x1] %v30_v8 }

// kernel: unet_up_block_forward.2
= control target key start
LH: loop header
LB: loop body
LE: loop exit
PB: predicated region body
PF: predicated region fallthrough
CT: control target
= control target key end

     0   :  { %vm104_vm0 = vcmask 1043456   ;;  %vm79_vm1 = vcmask 64512   ;;  %vm205_vm2 = vcmask 130048   ;;  %s404_s1 = inlined_call_operand.vmem [shape: bf16[8,16], index: 1, kind: input, shape index: {}]   ;;  %s405_s0 = inlined_call_operand.vmem [shape: bf16[128,8], index: 0, kind: input, shape index: {}]   ;;  %s406_s2 = inlined_call_operand.vmem [shape: f32[1,16], index: 2, kind: input, shape index: {}]   ;;  %s407_s3 = inlined_call_operand.vmem [shape: f32[128,16], index: 3, kind: output, shape index: {}]  }
   0x1   :  { %v31_v0 = vld [vmem:[%s404_s1] sm:$0xf]  ;;  %v276_v4 = vld [vmem:[%s405_s0 + $0x8] sm:$0xff]   ;;  %v278_v6 = vld [vmem:[%s405_s0 + $0x10] sm:$0xff]  }
   0x2   :  { %272 = vmatprep.subr.msk.bf16.mxu0 %vm104_vm0, %v31_v0  ;;  %273 = vmatprep.subr.msk.bf16.mxu1 %vm104_vm0, %v31_v0  ;;  %v106_v1 = vsel %vm104_vm0, %v31_v0, 0  ;;  %v274_v2 = vld [vmem:[%s405_s0] sm:$0xff]   ;;  %v277_v5 = vld [vmem:[%s405_s0 + $0x28] sm:$0xff]   ;;  %v279_v7 = vld [vmem:[%s405_s0 + $0x30] sm:$0xff]  }
   0x3   :  { %253 = vmatpush3.bf16.msra.mxu0 %v106_v1  ;;  %271 = vmatpush3.bf16.msra.mxu1 %v106_v1  ;;  %v275_v3 = vld [vmem:[%s405_s0 + $0x20] sm:$0xff]   ;;  %v280_v8 = vld [vmem:[%s405_s0 + $0x18] sm:$0xff]  }
   0x4   :  { %254 = vmatprep.mubr.msk.bf16.mxu0 %vm79_vm1, %v274_v2  ;;  %262 = vmatprep.mubr.msk.bf16.mxu1 %vm79_vm1, %v275_v3  ;;  %v281_v9 = vld [vmem:[%s405_s0 + $0x38] sm:$0xff]   ;;  %v226_v10 = vld [vmem:[%s406_s2] ss:$0 sm:$0xff] }
   0x6   :  { %255 = vmatmul.mubr.msk.bf16.vlgmr.msra.gmra.mrb[0].mxu0 %vm79_vm1, %v276_v4  ;;  %263 = vmatmul.mubr.msk.bf16.vlgmr.msra.gmra.mrb[0].mxu1 %vm79_vm1, %v277_v5 }
   0x7   :  { %258 = vmatprep.mubr.msk.bf16.mxu0 %vm79_vm1, %v278_v6  ;;  %266 = vmatprep.mubr.msk.bf16.mxu1 %vm79_vm1, %v279_v7 }
   0xe   :  { %259 = vmatmul.mubr.msk.bf16.gmra.mrb[4].mxu0 %vm79_vm1, %v280_v8  ;;  %267 = vmatmul.mubr.msk.bf16.gmra.mrb[4].mxu1 %vm79_vm1, %v281_v9 }
  0xd9   :  { %v256_v11 = vpop.f32.mrb[0].mxu0  ;;  %v264_v13 = vpop.f32.mrb[0].mxu1 }
  0xda   :  { %v151_v12 = vadd.f32 %v256_v11, %v226_v10  ;;  %v142_v14 = vpop.f32.mrb[1].mxu0  ;;  %v183_v15 = vadd.f32 %v264_v13, %v226_v10  ;;  %v174_v17 = vpop.f32.mrb[1].mxu1 }
  0xdb   :  { %v143_v16 = vadd.f32 %v226_v10, %v142_v14  ;;  %v257_v18 = vpop.f32.mrb[2].mxu0  ;;  %v175_v19 = vadd.f32 %v226_v10, %v174_v17  ;;  %v265_v21 = vpop.f32.mrb[2].mxu1 }
  0xdc   :  { %208 = vst.msk [vmem:[%s407_s3 + $0x10] sm:$0xff] %vm205_vm2, %v151_v12  ;;  %v154_v20 = vadd.f32 %v257_v18, %v226_v10  ;;  %v145_v22 = vpop.f32.mrb[3].mxu0  ;;  %216 = vst.msk [vmem:[%s407_s3 + $0x50] sm:$0xff] %vm205_vm2, %v183_v15  ;;  %v186_v23 = vadd.f32 %v265_v21, %v226_v10  ;;  %v177_v25 = vpop.f32.mrb[3].mxu1 }
  0xdd   :  { %206 = vst.msk [vmem:[%s407_s3] sm:$0xff] %vm205_vm2, %v143_v16  ;;  %v146_v24 = vadd.f32 %v226_v10, %v145_v22  ;;  %214 = vst.msk [vmem:[%s407_s3 + $0x40] sm:$0xff] %vm205_vm2, %v175_v19  ;;  %v178_v26 = vadd.f32 %v226_v10, %v177_v25 }
  0xde   :  { %209 = vst.msk [vmem:[%s407_s3 + $0x18] sm:$0xff] %vm205_vm2, %v154_v20  ;;  %217 = vst.msk [vmem:[%s407_s3 + $0x58] sm:$0xff] %vm205_vm2, %v186_v23 }
  0xdf   :  { %207 = vst.msk [vmem:[%s407_s3 + $0x8] sm:$0xff] %vm205_vm2, %v146_v24  ;;  %215 = vst.msk [vmem:[%s407_s3 + $0x48] sm:$0xff] %vm205_vm2, %v178_v26 }
  0xe1   :  { %v260_v27 = vpop.f32.mrb[4].mxu0  ;;  %v268_v29 = vpop.f32.mrb[4].mxu1 }
  0xe2   :  { %v167_v28 = vadd.f32 %v260_v27, %v226_v10  ;;  %v158_v30 = vpop.f32.mrb[5].mxu0  ;;  %v199_v31 = vadd.f32 %v268_v29, %v226_v10  ;;  %v190_v33 = vpop.f32.mrb[5].mxu1 }
  0xe3   :  { %v159_v32 = vadd.f32 %v226_v10, %v158_v30  ;;  %v261_v34 = vpop.f32.mrb[6].mxu0  ;;  %v191_v35 = vadd.f32 %v226_v10, %v190_v33  ;;  %v269_v37 = vpop.f32.mrb[6].mxu1 }
  0xe4   :  { %212 = vst.msk [vmem:[%s407_s3 + $0x30] sm:$0xff] %vm205_vm2, %v167_v28  ;;  %v170_v36 = vadd.f32 %v261_v34, %v226_v10  ;;  %v161_v38 = vpop.f32.mrb[7].mxu0  ;;  %220 = vst.msk [vmem:[%s407_s3 + $0x70] sm:$0xff] %vm205_vm2, %v199_v31  ;;  %v202_v39 = vadd.f32 %v269_v37, %v226_v10  ;;  %v193_v41 = vpop.f32.mrb[7].mxu1 }
  0xe5   :  { %210 = vst.msk [vmem:[%s407_s3 + $0x20] sm:$0xff] %vm205_vm2, %v159_v32  ;;  %v162_v40 = vadd.f32 %v226_v10, %v161_v38  ;;  %218 = vst.msk [vmem:[%s407_s3 + $0x60] sm:$0xff] %vm205_vm2, %v191_v35  ;;  %v194_v42 = vadd.f32 %v226_v10, %v193_v41 }
  0xe6   :  { %213 = vst.msk [vmem:[%s407_s3 + $0x38] sm:$0xff] %vm205_vm2, %v170_v36  ;;  %221 = vst.msk [vmem:[%s407_s3 + $0x78] sm:$0xff] %vm205_vm2, %v202_v39 }
  0xe7   :  { %211 = vst.msk [vmem:[%s407_s3 + $0x28] sm:$0xff] %vm205_vm2, %v162_v40  ;;  %219 = vst.msk [vmem:[%s407_s3 + $0x68] sm:$0xff] %vm205_vm2, %v194_v42 }

// kernel: unet_up_block_forward.3
= control target key start
LH: loop header
LB: loop body
LE: loop exit
PB: predicated region body
PF: predicated region fallthrough
CT: control target
= control target key end

     0   :  { %s6345_s21 = smov 0   ;;  %s7929_s0 = inlined_call_operand.vmem [shape: bf16[2,342,72], index: 0, kind: input, shape index: {}]   ;;  %s7930_s1 = inlined_call_operand.vmem [shape: f32[342,1], index: 1, kind: input, shape index: {}]   ;;  %s7931_s2 = inlined_call_operand.vmem [shape: bf16[72,4], index: 2, kind: input, shape index: {}]   ;;  %s7932_s3 = inlined_call_operand.vmem [shape: f32[1,4], index: 3, kind: input, shape index: {}]   ;;  %s7933_s4 = inlined_call_operand.vmem [shape: bf16[9,4,4], index: 4, kind: input, shape index: {}]   ;;  %s7934_s5 = inlined_call_operand.vmem [shape: f32[1,4], index: 5, kind: input, shape index: {}]   ;;  %s7935_s6 = inlined_call_operand.vmem [shape: f32[2,288,4], index: 6, kind: output, shape index: {}]  }
   0x1 LB: > { %s4906_s22 = sadd.s32 4294967295, %s6307_s21   ;;  %p4910_p0 = scmp.ge.s32.totalorder %s6307_s21, 1  ;;  %s6307_s21 = sphi %s6345_s21, %s16_s21  }
   0x2   : > { %p212_p1 = scmp.lt.s32.totalorder %s6307_s21, 3 }
   0x4   : > { %p213_p2 = pnand %p4910_p0, %p212_p1 }
   0x6   : > { %216 = sbr.rel (%p213_p2) target bundleno = 923 (0x39b), region = 44 }
   0xd   : > { %v6192_v0 = vld [vmem:[%s7931_s2] sm:$0xff]   ;;  %v6193_v1 = vld [vmem:[%s7931_s2 + $0x8] sm:$0xff]   ;;  %p242_p3 = scmp.lt.s32.totalorder %s4906_s22, 1  ;;  %v6194_v2 = vld [vmem:[%s7931_s2 + $0x10] sm:$0xff]   ;;  %v6309_v4 = vmov 0   ;;  %vm447_vm0 = vcmask 588800  }
   0xe   : > { %5482 = vmatprep.subr.bf16.mxu0 %v6192_v0  ;;  %v799_v3 = vld [vmem:[%s7930_s1 + $0xf0] sm:$0xff]  ;;  %6190 = vset.pattern.permute.xlu0 %v6309_v4  ;;  %v801_v5 = vld [vmem:[%s7930_s1 + $0x100] sm:$0xff]  ;;  %v6195_v6 = vld [vmem:[%s7931_s2 + $0x18] sm:$0xff]   ;;  %vm514_vm1 = vcmask 1043456   ;;  %vm1625_vm2 = vcmask 1041408   ;;  %vm1243_vm3 = vcmask 27648  }
   0xf   : > { %5483 = vmatpush3.bf16.msra.mxu0 %v6192_v0  ;;  %s8030_s22 = smov (!%p242_p3, %s4906_s22), 1  ;;  %6191 = vset.pattern.permute.xlu1 %v6309_v4  ;;  %v800_v7 = vld [vmem:[%s7930_s1 + $0xf8] sm:$0xff]  ;;  %v802_v8 = vld [vmem:[%s7930_s1 + $0x108] sm:$0xff]  ;;  %v6196_v10 = vld [vmem:[%s7931_s2 + $0x20] ss:$0 sps:$4 sm:$0xff]   ;;  %vm1570_vm5 = vcmask 31744  }
  0x10   : > { %5484 = vmatprep.subr.bf16.mxu0 %v6193_v1  ;;  %s6179_s7 = smul.u32 172, %s8030_s22  ;;  %964 = vperm.xlu0 %6190, %v799_v3   ;;  %v803_v11 = vld [vmem:[%s7930_s1 + $0x110] sm:$0xff]  ;;  %v804_v12 = vld [vmem:[%s7930_s1 + $0x118] sm:$0xff]  ;;  %v805_v13 = vld [vmem:[%s7930_s1 + $0x120] sm:$0xff]  ;;  %v516_v14 = vsel %vm514_vm1, %v6196_v10, 0  ;;  %vm2028_vm6 = vcmask 1046528  }
  0x11   : > { %974 = vperm.xlu1 %6191, %v801_v5   ;;  %v806_v15 = vld [vmem:[%s7930_s1 + $0x128] sm:$0xff]  ;;  %v807_v17 = vld [vmem:[%s7930_s1 + $0x130] sm:$0xff]  ;;  %v772_v20 = vld [vmem:[%s7930_s1 + $0x18] sm:$0xff]  ;;  %vm1421_vm4 = vsmask.f32 7424  ;;  %vm3228_vm8 = vcmask 1045504  }
  0x12   : > { %s6377_s14 = scalar_lea.vmem %s7929_s0, %s6179_s7  ;;  %v771_v19 = vld [vmem:[%s7930_s1 + $0x10] sm:$0xff]  ;;  %v773_v21 = vld [vmem:[%s7930_s1 + $0x20] sm:$0xff]  ;;  %v774_v24 = vld [vmem:[%s7930_s1 + $0x28] sm:$0xff]  ;;  %vm2781_vm7 = vsmask.f32 6400  ;;  %vm4428_vm10 = vcmask 1044480  }
  0x13   : > { %5485 = vmatpush3.bf16.msra.mxu0 %v6193_v1  ;;  %v6197_v9 = vld [vmem:[%s6377_s14] sm:$0xff]   ;;  %v6198_v16 = vld [vmem:[%s6377_s14 + $0x8] sm:$0xff]   ;;  %v6199_v18 = vld [vmem:[%s6377_s14 + $0x10] sm:$0xff]   ;;  %vm3981_vm9 = vsmask.f32 5376  ;;  %s6180_s15 = smul.u32 288, %s8030_s22 }
  0x14   : > { %5486 = vmatprep.subr.bf16.mxu0 %v6194_v2  ;;  %5492 = vmatprep.mubr.msk.bf16.mxu0 %vm447_vm0, %v6197_v9  ;;  %v6200_v22 = vld [vmem:[%s6377_s14 + $0x18] sm:$0xff]   ;;  %v6201_v23 = vld [vmem:[%s6377_s14 + $0x20] sm:$0xff]   ;;  %v775_v25 = vld [vmem:[%s7930_s1 + $0x30] sm:$0xff] }
  0x15   : > { %969 = vperm.xlu0 %6190, %v800_v7   ;;  %979 = vperm.xlu1 %6191, %v802_v8   ;;  %v776_v26 = vld [vmem:[%s7930_s1 + $0x38] sm:$0xff]  ;;  %v777_v27 = vld [vmem:[%s7930_s1 + $0x40] sm:$0xff]  ;;  %v6202_v28 = vld [vmem:[%s6377_s14 + $0x28] sm:$0xff]   ;;  %s7789_s19 = scalar_lea.vmem %s7935_s6, %s6180_s15 }
  0x16   : > { %v6203_v29 = vld [vmem:[%s6377_s14 + $0x30] sm:$0xff]   ;;  %v778_v30 = vld [vmem:[%s7930_s1 + $0x48] sm:$0xff]  ;;  %v780_v32 = vld [vmem:[%s7930_s1 + $0x58] sm:$0xff] }
  0x17   : > { %5487 = vmatpush3.bf16.msra.mxu0 %v6194_v2  ;;  %v779_v31 = vld [vmem:[%s7930_s1 + $0x50] sm:$0xff]  ;;  %v781_v33 = vld [vmem:[%s7930_s1 + $0x60] sm:$0xff]  ;;  %v6204_v34 = vld [vmem:[%s6377_s14 + $0x38] sm:$0xff]  }
  0x18   : > { %5488 = vmatprep.subr.bf16.mxu0 %v6195_v6  ;;  %v6205_v35 = vld [vmem:[%s6377_s14 + $0x40] sm:$0xff]   ;;  %v782_v36 = vld [vmem:[%s7930_s1 + $0x68] sm:$0xff]  ;;  %v783_v37 = vld [vmem:[%s7930_s1 + $0x70] sm:$0xff] }
  0x19   : > { %984 = vperm.xlu0 %6190, %v803_v11   ;;  %989 = vperm.xlu1 %6191, %v804_v12   ;;  %v784_v38 = vld [vmem:[%s7930_s1 + $0x78] sm:$0xff]  ;;  %v785_v39 = vld [vmem:[%s7930_s1 + $0x80] sm:$0xff]  ;;  %v6206_v40 = vld [vmem:[%s6377_s14 + $0x48] sm:$0xff]  }
  0x1a   : > { %v6207_v41 = vld [vmem:[%s6377_s14 + $0x50] sm:$0xff]   ;;  %v786_v42 = vld [vmem:[%s7930_s1 + $0x88] sm:$0xff]  ;;  %v788_v44 = vld [vmem:[%s7930_s1 + $0x98] sm:$0xff] }
  0x1b   : > { %5489 = vmatpush3.bf16.msra.mxu0 %v6195_v6  ;;  %v787_v43 = vld [vmem:[%s7930_s1 + $0x90] sm:$0xff]  ;;  %v789_v45 = vld [vmem:[%s7930_s1 + $0xa0] sm:$0xff]  ;;  %v6208_v46 = vld [vmem:[%s6377_s14 + $0x58] sm:$0xff]  }
  0x1c   : > { %6168 = vmatprep.subr.msk.bf16.mxu0 %vm514_vm1, %v6196_v10  ;;  %v6209_v47 = vld [vmem:[%s6377_s14 + $0x60] sm:$0xff]   ;;  %v790_v48 = vld [vmem:[%s7930_s1 + $0xa8] sm:$0xff]  ;;  %v791_v49 = vld [vmem:[%s7930_s1 + $0xb0] sm:$0xff] }
  0x1d   : > { %994 = vperm.xlu0 %6190, %v805_v13   ;;  %999 = vperm.xlu1 %6191, %v806_v15   ;;  %v792_v50 = vld [vmem:[%s7930_s1 + $0xb8] sm:$0xff]  ;;  %v793_v51 = vld [vmem:[%s7930_s1 + $0xc0] sm:$0xff]  ;;  %v6210_v52 = vld [vmem:[%s6377_s14 + $0x68] sm:$0xff]  }
  0x1e   : > { %v6211_v53 = vld [vmem:[%s6377_s14 + $0x70] sm:$0xff]   ;;  %v794_v54 = vld [vmem:[%s7930_s1 + $0xc8] sm:$0xff]  ;;  %v796_v56 = vld [vmem:[%s7930_s1 + $0xd8] sm:$0xff] }
  0x1f   : > { %5491 = vmatpush3.bf16.msra.mxu0 %v516_v14  ;;  %v795_v55 = vld [vmem:[%s7930_s1 + $0xd0] sm:$0xff]  ;;  %v797_v57 = vld [vmem:[%s7930_s1 + $0xe0] sm:$0xff]  ;;  %v6212_v58 = vld [vmem:[%s6377_s14 + $0x78] sm:$0xff]  }
  0x20   : > { %v6213_v59 = vld [vmem:[%s6377_s14 + $0x80] sm:$0xff]   ;;  %v798_v60 = vld [vmem:[%s7930_s1 + $0xe8] sm:$0xff]  ;;  %v808_v63 = vld [vmem:[%s7930_s1 + $0x138] sm:$0xff] }
  0x21   : > { %1004 = vperm.xlu0 %6190, %v807_v17   ;;  %824 = vperm.xlu1 %6191, %v771_v19   ;;  %v769_v61 = vld [vmem:[%s7930_s1] sm:$0xff]  ;;  %v770_v62 = vld [vmem:[%s7930_s1 + $0x8] sm:$0xff]  ;;  %v6215_v1 = vld [vmem:[%s6377_s14 + $0x90] sm:$0xff]  }
  0x22   : > { %5493 = vmatmul.mubr.msk.bf16.vlgmr.msra.gmra.mrb[0].mxu0 %vm447_vm0, %v6198_v16  ;;  %v6214_v0 = vld [vmem:[%s6377_s14 + $0x88] sm:$0xff]   ;;  %v809_v2 = vld [vmem:[%s7930_s1 + $0x140] sm:$0xff]  ;;  %v811_v4 = vld [vmem:[%s7930_s1 + $0x150] sm:$0x3f] }
  0x23   : > { %5496 = vmatprep.mubr.msk.bf16.mxu0 %vm447_vm0, %v6199_v18  ;;  %v810_v3 = vld [vmem:[%s7930_s1 + $0x148] sm:$0xff]  ;;  %v6216_v5 = vld [vmem:[%s6377_s14 + $0x98] sm:$0xff]   ;;  %v6217_v6 = vld [vmem:[%s6377_s14 + $0xa0] sm:$0xff]  }
  0x24   : > { %v6218_v7 = vld [vmem:[%s6377_s14 + $0xa8] ss:$0 sps:$4 sm:$0x77]   ;;  %v5006_v10 = vld [vmem:[%s7933_s4 + $0x2] sm:$0x3] }
  0x25   : > { %829 = vperm.xlu0 %6190, %v772_v20   ;;  %834 = vperm.xlu1 %6191, %v773_v21   ;;  %v1627_v11 = vsel %vm1625_vm2, %v5006_v10, 0 }
  0x26   : > { %6169 = vmatprep.subr.msk.bf16.mxu0 %vm1625_vm2, %v5006_v10 }
  0x27   : > { %5537 = vmatpush3.bf16.msra.mxu0 %v1627_v11 }
  0x29   : > { %839 = vperm.xlu0 %6190, %v774_v24   ;;  %844 = vperm.xlu1 %6191, %v775_v25  }
  0x2a   : > { %5497 = vmatmul.mubr.msk.bf16.gmra.mrb[4].mxu0 %vm447_vm0, %v6200_v22 }
  0x2b   : > { %5500 = vmatprep.mubr.msk.bf16.mxu0 %vm447_vm0, %v6201_v23 }
  0x2d   : > { %849 = vperm.xlu0 %6190, %v776_v26   ;;  %854 = vperm.xlu1 %6191, %v777_v27  }
  0x31   : > { %859 = vperm.xlu0 %6190, %v778_v30   ;;  %864 = vperm.xlu1 %6191, %v779_v31  }
  0x32   : > { %5501 = vmatmul.mubr.msk.bf16.gmra.mrb[8].mxu0 %vm447_vm0, %v6202_v28 }
  0x33   : > { %5504 = vmatprep.mubr.msk.bf16.mxu0 %vm447_vm0, %v6203_v29 }
  0x35   : > { %869 = vperm.xlu0 %6190, %v780_v32   ;;  %874 = vperm.xlu1 %6191, %v781_v33   ;;  %v5082_v33 = vld [vmem:[%s7933_s4 + $0x6] sm:$0x3] }
  0x36   : > { %6173 = vmatprep.subr.msk.bf16.mxu1 %vm1625_vm2, %v5082_v33 }
  0x39   : > { %879 = vperm.xlu0 %6190, %v782_v36   ;;  %884 = vperm.xlu1 %6191, %v783_v37   ;;  %v6611_v37 = vld [vmem:[%s7933_s4 + $0x8] sm:$0x3] }
  0x3a   : > { %5505 = vmatmul.mubr.msk.bf16.gmra.mrb[12].mxu0 %vm447_vm0, %v6204_v34  ;;  %v6601_v34 = vsel %vm1625_vm2, %v5082_v33, 0 }
  0x3b   : > { %5508 = vmatprep.mubr.msk.bf16.mxu0 %vm447_vm0, %v6205_v35  ;;  %5879 = vmatpush3.bf16.msra.mxu1 %v6601_v34 }
  0x3c   : > { %6174 = vmatprep.subr.msk.bf16.mxu1 %vm1625_vm2, %v6611_v37 }
  0x3d   : > { %889 = vperm.xlu0 %6190, %v784_v38   ;;  %894 = vperm.xlu1 %6191, %v785_v39  }
  0x41   : > { %899 = vperm.xlu0 %6190, %v786_v42   ;;  %904 = vperm.xlu1 %6191, %v787_v43  }
  0x42   : > { %5509 = vmatmul.mubr.msk.bf16.gmra.mrb[16].mxu0 %vm447_vm0, %v6206_v40  ;;  %v6622_v40 = vld [vmem:[%s7933_s4] sm:$0x3] }
  0x43   : > { %5512 = vmatprep.mubr.msk.bf16.mxu0 %vm447_vm0, %v6207_v41  ;;  %6170 = vmatprep.subr.msk.bf16.mxu0 %vm1625_vm2, %v6622_v40 }
  0x45   : > { %909 = vperm.xlu0 %6190, %v788_v44   ;;  %914 = vperm.xlu1 %6191, %v789_v45  }
  0x49   : > { %919 = vperm.xlu0 %6190, %v790_v48   ;;  %924 = vperm.xlu1 %6191, %v791_v49  }
  0x4a   : > { %5513 = vmatmul.mubr.msk.bf16.gmra.mrb[20].mxu0 %vm447_vm0, %v6208_v46 }
  0x4b   : > { %5516 = vmatprep.mubr.msk.bf16.mxu0 %vm447_vm0, %v6209_v47 }
  0x4d   : > { %929 = vperm.xlu0 %6190, %v792_v50   ;;  %934 = vperm.xlu1 %6191, %v793_v51   ;;  %v6647_v50 = vld [vmem:[%s7932_s3] ss:$0 sm:$0xff] }
  0x51   : > { %939 = vperm.xlu0 %6190, %v794_v54   ;;  %944 = vperm.xlu1 %6191, %v795_v55  }
  0x52   : > { %5517 = vmatmul.mubr.msk.bf16.gmra.mrb[24].mxu0 %vm447_vm0, %v6210_v52 }
  0x53   : > { %5520 = vmatprep.mubr.msk.bf16.mxu0 %vm447_vm0, %v6211_v53 }
  0x55   : > { %949 = vperm.xlu0 %6190, %v796_v56   ;;  %954 = vperm.xlu1 %6191, %v797_v57  }
  0x59   : > { %959 = vperm.xlu0 %6190, %v798_v60   ;;  %814 = vperm.xlu1 %6191, %v769_v61  }
  0x5a   : > { %5521 = vmatmul.mubr.msk.bf16.gmra.mrb[28].mxu0 %vm447_vm0, %v6212_v58 }
  0x5b   : > { %5524 = vmatprep.mubr.msk.bf16.mxu0 %vm447_vm0, %v6213_v59 }
  0x5d   : > { %819 = vperm.xlu0 %6190, %v770_v62   ;;  %1009 = vperm.xlu1 %6191, %v808_v63  }
  0x61   : > { %1014 = vperm.xlu0 %6190, %v809_v2   ;;  %1019 = vperm.xlu1 %6191, %v810_v3  }
  0x62   : > { %5525 = vmatmul.mubr.msk.bf16.gmra.mrb[32].mxu0 %vm447_vm0, %v6214_v0 }
  0x63   : > { %5528 = vmatprep.mubr.msk.bf16.mxu0 %vm447_vm0, %v6215_v1 }
  0x65   : > { %1024 = vperm.xlu0 %6190, %v811_v4  }
  0x6a   : > { %5529 = vmatmul.mubr.msk.bf16.gmra.mrb[36].mxu0 %vm447_vm0, %v6216_v5 }
  0x6b   : > { %5532 = vmatprep.mubr.msk.bf16.mxu0 %vm447_vm0, %v6217_v6 }
  0x72   : > { %5533 = vmatmul.mubr.msk.bf16.gmra.mrb[40].mxu0 %vm447_vm0, %v6218_v7 }
  0x8f   : > { %v6549_v8 = vpop.permute.xlu0 %964 }
  0x90   : > { %v6551_v9 = vpop.permute.xlu1 %974 }
  0x94   : > { %v6558_v12 = vpop.permute.xlu0 %969  ;;  %v6560_v13 = vpop.permute.xlu1 %979 }
  0x98   : > { %v6562_v14 = vpop.permute.xlu0 %984  ;;  %v6564_v15 = vpop.permute.xlu1 %989 }
  0x9c   : > { %v6566_v16 = vpop.permute.xlu0 %994  ;;  %v6568_v17 = vpop.permute.xlu1 %999 }
  0xa0   : > { %v6570_v18 = vpop.permute.xlu0 %1004  ;;  %v825_v19 = vpop.permute.xlu1 %824 }
  0xa4   : > { %v830_v20 = vpop.permute.xlu0 %829  ;;  %v6572_v21 = vpop.permute.xlu1 %834 }
  0xa8   : > { %v6574_v22 = vpop.permute.xlu0 %839  ;;  %v6576_v23 = vpop.permute.xlu1 %844 }
  0xac   : > { %v6578_v24 = vpop.permute.xlu0 %849  ;;  %v6580_v25 = vpop.permute.xlu1 %854 }
  0xb0   : > { %v6582_v26 = vpop.permute.xlu0 %859  ;;  %v6584_v27 = vpop.permute.xlu1 %864 }
  0xb4   : > { %v6586_v28 = vpop.permute.xlu0 %869  ;;  %v6588_v29 = vpop.permute.xlu1 %874 }
  0xb8   : > { %v6590_v30 = vpop.permute.xlu0 %879  ;;  %v6592_v31 = vpop.permute.xlu1 %884 }
  0xbc   : > { %v6594_v32 = vpop.permute.xlu0 %889  ;;  %v6604_v35 = vpop.permute.xlu1 %894 }
  0xc0   : > { %v6606_v36 = vpop.permute.xlu0 %899  ;;  %v6615_v38 = vpop.permute.xlu1 %904 }
  0xc4   : > { %v6617_v39 = vpop.permute.xlu0 %909  ;;  %v6626_v41 = vpop.permute.xlu1 %914 }
  0xc8   : > { %v6628_v42 = vpop.permute.xlu0 %919  ;;  %v6630_v43 = vpop.permute.xlu1 %924 }
  0xcc   : > { %v6632_v44 = vpop.permute.xlu0 %929  ;;  %v6634_v45 = vpop.permute.xlu1 %934 }
  0xd0   : > { %v6636_v46 = vpop.permute.xlu0 %939  ;;  %v6638_v47 = vpop.permute.xlu1 %944 }
  0xd4   : > { %v6640_v48 = vpop.permute.xlu0 %949  ;;  %v6642_v49 = vpop.permute.xlu1 %954 }
  0xd8   : > { %v6649_v51 = vpop.permute.xlu0 %959  ;;  %v815_v60 = vpop.permute.xlu1 %814 }
  0xdc   : > { %v820_v1 = vpop.permute.xlu0 %819 }
  0xf5   : > { %v5494_v52 = vpop.f32.mrb[0].mxu0 }
  0xf6   : > { %v561_v53 = vadd.f32 %v5494_v52, %v6647_v50  ;;  %v552_v54 = vpop.f32.mrb[1].mxu0 }
  0xf7   : > { %v553_v55 = vadd.f32 %v6647_v50, %v552_v54  ;;  %v5495_v56 = vpop.f32.mrb[2].mxu0 }
  0xf8   : > { %v728_v57 = vmax.f32 %v561_v53, 0.0  ;;  %v564_v58 = vadd.f32 %v5495_v56, %v6647_v50  ;;  %v555_v59 = vpop.f32.mrb[3].mxu0 }
  0xf9   : > { %v726_v61 = vmax.f32 %v553_v55, 0.0  ;;  %v556_v62 = vadd.f32 %v6647_v50, %v555_v59 }
  0xfa   : > { %v1029_v63 = vmul.f32 %v825_v19, %v728_v57  ;;  %v729_v0 = vmax.f32 %v564_v58, 0.0 }
  0xfb   : > { %v727_v2 = vmax.f32 %v556_v62, 0.0  ;;  %v1027_v3 = vmul.f32 %v815_v60, %v726_v61 }
  0xfc   : > { %v5243_v4 = vpack.c.bf16 %v1029_v63, %v1029_v63  ;;  %v1030_v5 = vmul.f32 %v830_v20, %v729_v0 }
  0xfd   : > { %v5241_v6 = vpack.c.bf16 %v1027_v3, %v1027_v3  ;;  %v1028_v7 = vmul.f32 %v820_v1, %v727_v2  ;;  %v5498_v10 = vpop.f32.mrb[4].mxu0 }
  0xfe   : > { %1246 = vst.msk [vmem:[#allocation2 + $0x8] sm:$0xf] %vm1243_vm3, %v5243_v4  ;;  %v5244_v11 = vpack.c.bf16 %v1030_v5, %v1030_v5  ;;  %v577_v33 = vadd.f32 %v5498_v10, %v6647_v50  ;;  %v568_v52 = vpop.f32.mrb[5].mxu0 }
  0xff   : > { %1244 = vst.msk [vmem:[#allocation2] sm:$0xf] %vm1243_vm3, %v5241_v6  ;;  %v5242_v53 = vpack.c.bf16 %v1028_v7, %v1028_v7  ;;  %v569_v19 = vadd.f32 %v6647_v50, %v568_v52  ;;  %v5499_v54 = vpop.f32.mrb[6].mxu0 }
 0x100   : > { %1247 = vst.msk [vmem:[#allocation2 + $0xc] sm:$0xf] %vm1243_vm3, %v5244_v11  ;;  %v732_v55 = vmax.f32 %v577_v33, 0.0  ;;  %v580_v20 = vadd.f32 %v5499_v54, %v6647_v50  ;;  %v571_v56 = vpop.f32.mrb[7].mxu0 }
 0x101   : > { %1245 = vst.msk [vmem:[#allocation2 + $0x4] sm:$0xf] %vm1243_vm3, %v5242_v53  ;;  %v730_v57 = vmax.f32 %v569_v19, 0.0  ;;  %v572_v58 = vadd.f32 %v6647_v50, %v571_v56 }
 0x102   : > { %v1033_v59 = vmul.f32 %v6576_v23, %v732_v55  ;;  %v733_v60 = vmax.f32 %v580_v20, 0.0 }
 0x103   : > { %v1031_v61 = vmul.f32 %v6572_v21, %v730_v57  ;;  %v731_v62 = vmax.f32 %v572_v58, 0.0 }
 0x104   : > { %v5247_v63 = vpack.c.bf16 %v1033_v59, %v1033_v59  ;;  %v1034_v0 = vmul.f32 %v6578_v24, %v733_v60 }
 0x105   : > { %v5245_v1 = vpack.c.bf16 %v1031_v61, %v1031_v61  ;;  %v1032_v2 = vmul.f32 %v6574_v22, %v731_v62  ;;  %v5502_v3 = vpop.f32.mrb[8].mxu0 }
 0x106   : > { %1250 = vst.msk [vmem:[#allocation2 + $0x18] sm:$0xf] %vm1243_vm3, %v5247_v63  ;;  %v5248_v4 = vpack.c.bf16 %v1034_v0, %v1034_v0  ;;  %v593_v5 = vadd.f32 %v5502_v3, %v6647_v50  ;;  %v584_v6 = vpop.f32.mrb[9].mxu0  ;;  %v1288_v33 = vld [vmem:[#allocation2] sm:$0xf] }
 0x107   : > { %1248 = vst.msk [vmem:[#allocation2 + $0x10] sm:$0xf] %vm1243_vm3, %v5245_v1  ;;  %v5246_v23 = vpack.c.bf16 %v1032_v2, %v1032_v2  ;;  %v585_v7 = vadd.f32 %v6647_v50, %v584_v6  ;;  %v5503_v21 = vpop.f32.mrb[10].mxu0  ;;  %v6220_v10 = vld [vmem:[#allocation2 + $0x8] sm:$0xff]  }
 0x108   : > { %1251 = vst.msk [vmem:[#allocation2 + $0x1c] sm:$0xf] %vm1243_vm3, %v5248_v4  ;;  %v736_v24 = vmax.f32 %v593_v5, 0.0  ;;  %v596_v11 = vadd.f32 %v5503_v21, %v6647_v50  ;;  %v587_v22 = vpop.f32.mrb[11].mxu0  ;;  %v1289_v52 = vld [vmem:[#allocation2 + $0x4] sm:$0xf] }
 0x109   : > { %1249 = vst.msk [vmem:[#allocation2 + $0x14] sm:$0xf] %vm1243_vm3, %v5246_v23  ;;  %v734_v53 = vmax.f32 %v585_v7, 0.0  ;;  %v588_v19 = vadd.f32 %v6647_v50, %v587_v22  ;;  %v6675_v54 = vcombine.low %v1288_v33, %v1289_v52  ;;  %v1430_v59 = vshll.u32 %v6220_v10, 16 }
 0x10a   : > { %v1037_v55 = vmul.f32 %v6584_v27, %v736_v24  ;;  %v737_v20 = vmax.f32 %v596_v11, 0.0  ;;  %v1434_v11 = vshrl.u32 %v6220_v10, 16 }
 0x10b   : > { %v1035_v56 = vmul.f32 %v6580_v25, %v734_v53  ;;  %v735_v57 = vmax.f32 %v588_v19, 0.0  ;;  %v1425_v58 = vshll.u32 %v6675_v54, 16  ;;  %v1423_v1 = vshrl.u32 %v6675_v54, 16 }
 0x10c   : > { %v5251_v60 = vpack.c.bf16 %v1037_v55, %v1037_v55  ;;  %v1038_v61 = vmul.f32 %v6586_v28, %v737_v20  ;;  %v1432_v23 = vrot.slane %v1430_v59, 1  ;;  %v1843_v59 = vsel %vm1625_vm2, %v6622_v40, 0 }
 0x10d   : > { %v5249_v62 = vpack.c.bf16 %v1035_v56, %v1035_v56  ;;  %v1036_v63 = vmul.f32 %v6582_v26, %v735_v57  ;;  %v5506_v0 = vpop.f32.mrb[12].mxu0  ;;  %v1427_v2 = vrot.slane %v1425_v58, 1 }
 0x10e   : > { %1254 = vst.msk [vmem:[#allocation2 + $0x28] sm:$0xf] %vm1243_vm3, %v5251_v60  ;;  %v5252_v27 = vpack.c.bf16 %v1038_v61, %v1038_v61  ;;  %v609_v25 = vadd.f32 %v5506_v0, %v6647_v50  ;;  %v600_v3 = vpop.f32.mrb[13].mxu0  ;;  %v1436_v58 = vor.u32 %v1434_v11, %v1432_v23 }
 0x10f   : > { %1252 = vst.msk [vmem:[#allocation2 + $0x20] sm:$0xf] %vm1243_vm3, %v5249_v62  ;;  %v5250_v4 = vpack.c.bf16 %v1036_v63, %v1036_v63  ;;  %v601_v28 = vadd.f32 %v6647_v50, %v600_v3  ;;  %v5507_v5 = vpop.f32.mrb[14].mxu0  ;;  %v1428_v6 = vor.u32 %v1427_v2, %v1423_v1  ;;  %v6222_v26 = vld [vmem:[#allocation2 + $0x18] sm:$0xff]  }
 0x110   : > { %1255 = vst.msk [vmem:[#allocation2 + $0x2c] sm:$0xf] %vm1243_vm3, %v5252_v27  ;;  %v740_v7 = vmax.f32 %v609_v25, 0.0  ;;  %v612_v21 = vadd.f32 %v5507_v5, %v6647_v50  ;;  %v603_v24 = vpop.f32.mrb[15].mxu0  ;;  %v6689_v22 = vld [vmem:[#allocation2 + $0x10] sm:$0xff]   ;;  %v1446_v19 = vshll.u32 %v6222_v26, 16 }
 0x111   : > { %1253 = vst.msk [vmem:[#allocation2 + $0x24] sm:$0xf] %vm1243_vm3, %v5250_v4  ;;  %v738_v33 = vmax.f32 %v601_v28, 0.0  ;;  %v604_v52 = vadd.f32 %v6647_v50, %v603_v24  ;;  %v1433_v53 = vsel %vm1421_vm4, %v1428_v6, %v1432_v23  ;;  %v1438_v56 = vshll.u32 %v6689_v22, 16 }
 0x112   : > { %v1041_v55 = vmul.f32 %v6592_v31, %v740_v7  ;;  %v741_v20 = vmax.f32 %v612_v21, 0.0  ;;  %5538 = vmatprep.mubr.msk.bf16.mxu0 %vm1570_vm5, %v1433_v53  ;;  %v1442_v63 = vshrl.u32 %v6689_v22, 16  ;;  %v1448_v2 = vrot.slane %v1446_v19, 1 }
 0x113   : > { %v1039_v57 = vmul.f32 %v6588_v29, %v738_v33  ;;  %v739_v10 = vmax.f32 %v604_v52, 0.0  ;;  %v1440_v62 = vrot.slane %v1438_v56, 1  ;;  %v1450_v33 = vshrl.u32 %v6222_v26, 16 }
 0x114   : > { %v5255_v60 = vpack.c.bf16 %v1041_v55, %v1041_v55  ;;  %v1042_v61 = vmul.f32 %v6594_v32, %v741_v20 }
 0x115   : > { %v5253_v0 = vpack.c.bf16 %v1039_v57, %v1039_v57  ;;  %v1040_v31 = vmul.f32 %v6590_v30, %v739_v10  ;;  %v5510_v1 = vpop.f32.mrb[16].mxu0  ;;  %v1441_v3 = vsel %vm1421_vm4, %v1436_v58, %v1440_v62  ;;  %v1444_v40 = vor.u32 %v1442_v63, %v1440_v62 }
 0x116   : > { %1258 = vst.msk [vmem:[#allocation2 + $0x38] sm:$0xf] %vm1243_vm3, %v5255_v60  ;;  %v5256_v27 = vpack.c.bf16 %v1042_v61, %v1042_v61  ;;  %v625_v29 = vadd.f32 %v5510_v1, %v6647_v50  ;;  %v616_v25 = vpop.f32.mrb[17].mxu0  ;;  %5539 = vmatmul.mubr.msk.bf16.vlgmr.msra.gmra.mrb[44].mxu0 %vm1570_vm5, %v1441_v3  ;;  %v1452_v57 = vor.u32 %v1450_v33, %v1448_v2 }
 0x117   : > { %1256 = vst.msk [vmem:[#allocation2 + $0x30] sm:$0xf] %vm1243_vm3, %v5253_v0  ;;  %v5254_v32 = vpack.c.bf16 %v1040_v31, %v1040_v31  ;;  %v617_v4 = vadd.f32 %v6647_v50, %v616_v25  ;;  %v5511_v28 = vpop.f32.mrb[18].mxu0  ;;  %v6709_v30 = vld [vmem:[#allocation2 + $0x28] sm:$0xff]   ;;  %v1449_v7 = vsel %vm1421_vm4, %v1444_v40, %v1448_v2  ;;  %5575 = vmatpush3.bf16.msra.mxu0 %v1843_v59 }
 0x118   : > { %1259 = vst.msk [vmem:[#allocation2 + $0x3c] sm:$0xf] %vm1243_vm3, %v5256_v27  ;;  %v744_v5 = vmax.f32 %v625_v29, 0.0  ;;  %v628_v6 = vadd.f32 %v5511_v28, %v6647_v50  ;;  %v619_v23 = vpop.f32.mrb[19].mxu0  ;;  %v6714_v21 = vld [vmem:[#allocation2 + $0x20] sm:$0xff]   ;;  %5542 = vmatprep.mubr.msk.bf16.mxu0 %vm1570_vm5, %v1449_v7  ;;  %v1462_v52 = vshll.u32 %v6709_v30, 16 }
 0x119   : > { %1257 = vst.msk [vmem:[#allocation2 + $0x34] sm:$0xf] %vm1243_vm3, %v5254_v32  ;;  %v742_v24 = vmax.f32 %v617_v4, 0.0  ;;  %v620_v11 = vadd.f32 %v6647_v50, %v619_v23  ;;  %v1454_v55 = vshll.u32 %v6714_v21, 16  ;;  %v1458_v60 = vshrl.u32 %v6714_v21, 16 }
 0x11a   : > { %v1045_v53 = vmul.f32 %v6615_v38, %v744_v5  ;;  %v745_v19 = vmax.f32 %v628_v6, 0.0  ;;  %v1464_v63 = vrot.slane %v1462_v52, 1  ;;  %v1466_v5 = vshrl.u32 %v6709_v30, 16 }
 0x11b   : > { %v1043_v20 = vmul.f32 %v6604_v35, %v742_v24  ;;  %v743_v56 = vmax.f32 %v620_v11, 0.0  ;;  %v1456_v59 = vrot.slane %v1454_v55, 1 }
 0x11c   : > { %v5259_v10 = vpack.c.bf16 %v1045_v53, %v1045_v53  ;;  %v1046_v58 = vmul.f32 %v6617_v39, %v745_v19  ;;  %v1468_v52 = vor.u32 %v1466_v5, %v1464_v63  ;;  %v6750_v53 = vld [vmem:[%s7933_s4 + $0x4] sm:$0x3] }
 0x11d   : > { %v5257_v61 = vpack.c.bf16 %v1043_v20, %v1043_v20  ;;  %v1044_v26 = vmul.f32 %v6606_v36, %v743_v56  ;;  %v5514_v62 = vpop.f32.mrb[20].mxu0  ;;  %v1457_v35 = vsel %vm1421_vm4, %v1452_v57, %v1456_v59  ;;  %v1460_v1 = vor.u32 %v1458_v60, %v1456_v59  ;;  %6171 = vmatprep.subr.msk.bf16.mxu0 %vm1625_vm2, %v6750_v53 }
 0x11e   : > { %1262 = vst.msk [vmem:[#allocation2 + $0x48] sm:$0xf] %vm1243_vm3, %v5259_v10  ;;  %v5260_v38 = vpack.c.bf16 %v1046_v58, %v1046_v58  ;;  %v641_v0 = vadd.f32 %v5514_v62, %v6647_v50  ;;  %v632_v31 = vpop.f32.mrb[21].mxu0  ;;  %5543 = vmatmul.mubr.msk.bf16.gmra.mrb[48].mxu0 %vm1570_vm5, %v1457_v35 }
 0x11f   : > { %1260 = vst.msk [vmem:[#allocation2 + $0x40] sm:$0xf] %vm1243_vm3, %v5257_v61  ;;  %v5258_v39 = vpack.c.bf16 %v1044_v26, %v1044_v26  ;;  %v633_v2 = vadd.f32 %v6647_v50, %v632_v31  ;;  %v5515_v27 = vpop.f32.mrb[22].mxu0  ;;  %v6732_v36 = vld [vmem:[#allocation2 + $0x38] sm:$0xff]   ;;  %v1465_v40 = vsel %vm1421_vm4, %v1460_v1, %v1464_v63 }
 0x120   : > { %1263 = vst.msk [vmem:[#allocation2 + $0x4c] sm:$0xf] %vm1243_vm3, %v5260_v38  ;;  %v748_v29 = vmax.f32 %v641_v0, 0.0  ;;  %v644_v25 = vadd.f32 %v5515_v27, %v6647_v50  ;;  %v635_v3 = vpop.f32.mrb[23].mxu0  ;;  %v6737_v32 = vld [vmem:[#allocation2 + $0x30] sm:$0xff]   ;;  %5546 = vmatprep.mubr.msk.bf16.mxu0 %vm1570_vm5, %v1465_v40  ;;  %v1478_v6 = vshll.u32 %v6732_v36, 16 }
 0x121   : > { %1261 = vst.msk [vmem:[#allocation2 + $0x44] sm:$0xf] %vm1243_vm3, %v5258_v39  ;;  %v746_v4 = vmax.f32 %v633_v2, 0.0  ;;  %v636_v28 = vadd.f32 %v6647_v50, %v635_v3  ;;  %v1470_v24 = vshll.u32 %v6737_v32, 16  ;;  %v1474_v56 = vshrl.u32 %v6737_v32, 16 }
 0x122   : > { %v1049_v23 = vmul.f32 %v6630_v43, %v748_v29  ;;  %v749_v7 = vmax.f32 %v644_v25, 0.0  ;;  %v1480_v10 = vrot.slane %v1478_v6, 1  ;;  %v1482_v27 = vshrl.u32 %v6732_v36, 16 }
 0x123   : > { %v1047_v11 = vmul.f32 %v6626_v41, %v746_v4  ;;  %v747_v33 = vmax.f32 %v636_v28, 0.0  ;;  %v1472_v20 = vrot.slane %v1470_v24, 1 }
 0x124   : > { %v5263_v19 = vpack.c.bf16 %v1049_v23, %v1049_v23  ;;  %v1050_v55 = vmul.f32 %v6632_v44, %v749_v7  ;;  %v1484_v5 = vor.u32 %v1482_v27, %v1480_v10 }
 0x125   : > { %v5261_v43 = vpack.c.bf16 %v1047_v11, %v1047_v11  ;;  %v1048_v57 = vmul.f32 %v6628_v42, %v747_v33  ;;  %v5518_v41 = vpop.f32.mrb[24].mxu0  ;;  %v1473_v61 = vsel %vm1421_vm4, %v1468_v52, %v1472_v20  ;;  %v1476_v44 = vor.u32 %v1474_v56, %v1472_v20 }
 0x126   : > { %1266 = vst.msk [vmem:[#allocation2 + $0x58] sm:$0xf] %vm1243_vm3, %v5263_v19  ;;  %v5264_v58 = vpack.c.bf16 %v1050_v55, %v1050_v55  ;;  %v657_v59 = vadd.f32 %v5518_v41, %v6647_v50  ;;  %v648_v60 = vpop.f32.mrb[25].mxu0  ;;  %5547 = vmatmul.mubr.msk.bf16.gmra.mrb[52].mxu0 %vm1570_vm5, %v1473_v61  ;;  %v6789_v41 = vld [vmem:[#allocation2 + $0xc] sm:$0xf] }
 0x127   : > { %1264 = vst.msk [vmem:[#allocation2 + $0x50] sm:$0xf] %vm1243_vm3, %v5261_v43  ;;  %v5262_v26 = vpack.c.bf16 %v1048_v57, %v1048_v57  ;;  %v649_v62 = vadd.f32 %v6647_v50, %v648_v60  ;;  %v5519_v63 = vpop.f32.mrb[26].mxu0  ;;  %v6763_v42 = vld [vmem:[#allocation2 + $0x48] sm:$0xff]   ;;  %v1481_v35 = vsel %vm1421_vm4, %v1476_v44, %v1480_v10 }
 0x128   : > { %1267 = vst.msk [vmem:[#allocation2 + $0x5c] sm:$0xf] %vm1243_vm3, %v5264_v58  ;;  %v752_v38 = vmax.f32 %v657_v59, 0.0  ;;  %v660_v0 = vadd.f32 %v5519_v63, %v6647_v50  ;;  %v651_v31 = vpop.f32.mrb[27].mxu0  ;;  %v6768_v1 = vld [vmem:[#allocation2 + $0x40] sm:$0xff]   ;;  %5550 = vmatprep.mubr.msk.bf16.mxu0 %vm1570_vm5, %v1481_v35  ;;  %v1494_v29 = vshll.u32 %v6763_v42, 16 }
 0x129   : > { %1265 = vst.msk [vmem:[#allocation2 + $0x54] sm:$0xf] %vm1243_vm3, %v5262_v26  ;;  %v750_v39 = vmax.f32 %v649_v62, 0.0  ;;  %v652_v2 = vadd.f32 %v6647_v50, %v651_v31  ;;  %v1486_v40 = vshll.u32 %v6768_v1, 16  ;;  %v1490_v24 = vshrl.u32 %v6768_v1, 16 }
 0x12a   : > { %v1053_v25 = vmul.f32 %v6638_v47, %v752_v38  ;;  %v753_v3 = vmax.f32 %v660_v0, 0.0  ;;  %v1496_v19 = vrot.slane %v1494_v29, 1  ;;  %v1498_v62 = vshrl.u32 %v6763_v42, 16  ;;  %v2336_v35 = vld [vmem:[#allocation2 + $0x8] sm:$0xe] }
 0x12b   : > { %v1051_v4 = vmul.f32 %v6634_v45, %v750_v39  ;;  %v751_v28 = vmax.f32 %v652_v2, 0.0  ;;  %v1488_v7 = vrot.slane %v1486_v40, 1  ;;  %v6805_v29 = vcombine.low %v2336_v35, %v6789_v41 }
 0x12c   : > { %v5267_v6 = vpack.c.bf16 %v1053_v25, %v1053_v25  ;;  %v1054_v23 = vmul.f32 %v6640_v48, %v753_v3  ;;  %v1500_v27 = vor.u32 %v1498_v62, %v1496_v19  ;;  %v6807_v25 = vld [vmem:[#allocation2 + $0x10] sm:$0xff]  }
 0x12d   : > { %v5265_v11 = vpack.c.bf16 %v1051_v4, %v1051_v4  ;;  %v1052_v33 = vmul.f32 %v6636_v46, %v751_v28  ;;  %v5522_v52 = vpop.f32.mrb[28].mxu0  ;;  %v1489_v45 = vsel %vm1421_vm4, %v1484_v5, %v1488_v7  ;;  %v1492_v56 = vor.u32 %v1490_v24, %v1488_v7  ;;  %7945 = vst [vmem:[#allocation3_spill] sm:$0xff] %v6805_v29 }
 0x12e   : > { %1270 = vst.msk [vmem:[#allocation2 + $0x68] sm:$0xf] %vm1243_vm3, %v5267_v6  ;;  %v5268_v47 = vpack.c.bf16 %v1054_v23, %v1054_v23  ;;  %v673_v55 = vadd.f32 %v5522_v52, %v6647_v50  ;;  %v664_v20 = vpop.f32.mrb[29].mxu0  ;;  %5551 = vmatmul.mubr.msk.bf16.gmra.mrb[56].mxu0 %vm1570_vm5, %v1489_v45  ;;  %v2786_v62 = vshll.u32 %v6805_v29, 16 }
 0x12f   : > { %1268 = vst.msk [vmem:[#allocation2 + $0x60] sm:$0xf] %vm1243_vm3, %v5265_v11  ;;  %v5266_v48 = vpack.c.bf16 %v1052_v33, %v1052_v33  ;;  %v665_v43 = vadd.f32 %v6647_v50, %v664_v20  ;;  %v5523_v57 = vpop.f32.mrb[30].mxu0  ;;  %v6787_v46 = vld [vmem:[#allocation2 + $0x58] sm:$0xff]   ;;  %v1497_v60 = vsel %vm1421_vm4, %v1492_v56, %v1496_v19 }
 0x130   : > { %1271 = vst.msk [vmem:[#allocation2 + $0x6c] sm:$0xf] %vm1243_vm3, %v5268_v47  ;;  %v756_v10 = vmax.f32 %v673_v55, 0.0  ;;  %v676_v58 = vadd.f32 %v5523_v57, %v6647_v50  ;;  %v667_v59 = vpop.f32.mrb[31].mxu0  ;;  %v6794_v61 = vld [vmem:[#allocation2 + $0x50] sm:$0xff]   ;;  %5554 = vmatprep.mubr.msk.bf16.mxu0 %vm1570_vm5, %v1497_v60  ;;  %v1510_v63 = vshll.u32 %v6787_v46, 16 }
 0x131   : > { %1269 = vst.msk [vmem:[#allocation2 + $0x64] sm:$0xf] %vm1243_vm3, %v5266_v48  ;;  %v754_v44 = vmax.f32 %v665_v43, 0.0  ;;  %v668_v26 = vadd.f32 %v6647_v50, %v667_v59  ;;  %v1502_v31 = vshll.u32 %v6794_v61, 16  ;;  %v1506_v28 = vshrl.u32 %v6794_v61, 16 }
 0x132   : > { %v1057_v38 = vmul.f32 %v6549_v8, %v756_v10  ;;  %v757_v0 = vmax.f32 %v676_v58, 0.0  ;;  %v1512_v23 = vrot.slane %v1510_v63, 1  ;;  %v6822_v47 = vsel %vm1625_vm2, %v6611_v37, 0 }
 0x133   : > { %v1055_v39 = vmul.f32 %v6642_v49, %v754_v44  ;;  %v755_v2 = vmax.f32 %v668_v26, 0.0  ;;  %v1504_v4 = vrot.slane %v1502_v31, 1  ;;  %v2791_v55 = vshrl.u32 %v6807_v25, 16 }
 0x134   : > { %v5271_v3 = vpack.c.bf16 %v1057_v38, %v1057_v38  ;;  %v1058_v40 = vmul.f32 %v6558_v12, %v757_v0  ;;  %v2783_v57 = vshrl.u32 %v6805_v29, 16  ;;  %v1514_v58 = vshrl.u32 %v6787_v46, 16 }
 0x135   : > { %v5269_v8 = vpack.c.bf16 %v1055_v39, %v1055_v39  ;;  %v1056_v5 = vmul.f32 %v6649_v51, %v755_v2  ;;  %v5526_v6 = vpop.f32.mrb[32].mxu0  ;;  %v1505_v11 = vsel %vm1421_vm4, %v1500_v27, %v1504_v4  ;;  %v1508_v33 = vor.u32 %v1506_v28, %v1504_v4 }
 0x136   : > { %1274 = vst.msk [vmem:[#allocation2 + $0x78] sm:$0xf] %vm1243_vm3, %v5271_v3  ;;  %v5272_v49 = vpack.c.bf16 %v1058_v40, %v1058_v40  ;;  %v689_v7 = vadd.f32 %v5526_v6, %v6647_v50  ;;  %v680_v24 = vpop.f32.mrb[33].mxu0  ;;  %5555 = vmatmul.mubr.msk.bf16.gmra.mrb[60].mxu0 %vm1570_vm5, %v1505_v11  ;;  %v1516_v0 = vor.u32 %v1514_v58, %v1512_v23  ;;  %v6840_v31 = vrot.slane %v2791_v55, 1 }
 0x137   : > { %1272 = vst.msk [vmem:[#allocation2 + $0x70] sm:$0xf] %vm1243_vm3, %v5269_v8  ;;  %v5270_v12 = vpack.c.bf16 %v1056_v5, %v1056_v5  ;;  %v681_v52 = vadd.f32 %v6647_v50, %v680_v24  ;;  %v5527_v19 = vpop.f32.mrb[34].mxu0  ;;  %v6818_v51 = vld [vmem:[#allocation2 + $0x68] sm:$0xff]   ;;  %v1513_v48 = vsel %vm1421_vm4, %v1508_v33, %v1512_v23  ;;  %v6848_v23 = vld [vmem:[#allocation2 + $0x18] sm:$0xff]  }
 0x138   : > { %1275 = vst.msk [vmem:[#allocation2 + $0x7c] sm:$0xf] %vm1243_vm3, %v5272_v49  ;;  %v760_v20 = vmax.f32 %v689_v7, 0.0  ;;  %v692_v45 = vadd.f32 %v5527_v19, %v6647_v50  ;;  %v683_v56 = vpop.f32.mrb[35].mxu0  ;;  %v6828_v43 = vld [vmem:[#allocation2 + $0x60] sm:$0xff]   ;;  %5558 = vmatprep.mubr.msk.bf16.mxu0 %vm1570_vm5, %v1513_v48  ;;  %v1526_v59 = vshll.u32 %v6818_v51, 16 }
 0x139   : > { %1273 = vst.msk [vmem:[#allocation2 + $0x74] sm:$0xf] %vm1243_vm3, %v5270_v12  ;;  %v758_v10 = vmax.f32 %v681_v52, 0.0  ;;  %v684_v37 = vadd.f32 %v6647_v50, %v683_v56  ;;  %v1518_v26 = vshll.u32 %v6828_v43, 16  ;;  %v1522_v27 = vshrl.u32 %v6828_v43, 16 }
 0x13a   : > { %v1061_v60 = vmul.f32 %v6562_v14, %v760_v20  ;;  %v761_v44 = vmax.f32 %v692_v45, 0.0  ;;  %v1528_v4 = vrot.slane %v1526_v59, 1  ;;  %v2794_v19 = vshll.u32 %v6807_v25, 16  ;;  %v1015_v59 = vpop.permute.xlu0 %1014 }
 0x13b   : > { %v1059_v63 = vmul.f32 %v6551_v9, %v758_v10  ;;  %v759_v38 = vmax.f32 %v684_v37, 0.0  ;;  %v1520_v2 = vrot.slane %v1518_v26, 1  ;;  %v1530_v45 = vshrl.u32 %v6818_v51, 16 }
 0x13c   : > { %v5275_v35 = vpack.c.bf16 %v1061_v60, %v1061_v60  ;;  %v1062_v39 = vmul.f32 %v6564_v15, %v761_v44  ;;  %v2800_v58 = vshrl.u32 %v6848_v23, 16  ;;  %v1010_v60 = vpop.permute.xlu1 %1009 }
 0x13d   : > { %v5273_v3 = vpack.c.bf16 %v1059_v63, %v1059_v63  ;;  %v1060_v14 = vmul.f32 %v6560_v13, %v759_v38  ;;  %v5530_v40 = vpop.f32.mrb[36].mxu0  ;;  %v1521_v5 = vsel %vm1421_vm4, %v1516_v0, %v1520_v2  ;;  %v1524_v6 = vor.u32 %v1522_v27, %v1520_v2 }
 0x13e   : > { %1278 = vst.msk [vmem:[#allocation2 + $0x88] sm:$0xf] %vm1243_vm3, %v5275_v35  ;;  %v5276_v28 = vpack.c.bf16 %v1062_v39, %v1062_v39  ;;  %v705_v9 = vadd.f32 %v5530_v40, %v6647_v50  ;;  %v696_v8 = vpop.f32.mrb[37].mxu0  ;;  %5559 = vmatmul.mubr.msk.bf16.gmra.mrb[64].mxu0 %vm1570_vm5, %v1521_v5  ;;  %v1532_v63 = vor.u32 %v1530_v45, %v1528_v4 }
 0x13f   : > { %1276 = vst.msk [vmem:[#allocation2 + $0x80] sm:$0xf] %vm1243_vm3, %v5273_v3  ;;  %v5274_v15 = vpack.c.bf16 %v1060_v14, %v1060_v14  ;;  %v697_v49 = vadd.f32 %v6647_v50, %v696_v8  ;;  %v5531_v7 = vpop.f32.mrb[38].mxu0  ;;  %v6853_v13 = vld [vmem:[#allocation2 + $0x78] sm:$0xff]   ;;  %v1529_v12 = vsel %vm1421_vm4, %v1524_v6, %v1528_v4 }
 0x140   : > { %1279 = vst.msk [vmem:[#allocation2 + $0x8c] sm:$0xf] %vm1243_vm3, %v5276_v28  ;;  %v764_v24 = vmax.f32 %v705_v9, 0.0  ;;  %v708_v11 = vadd.f32 %v5531_v7, %v6647_v50  ;;  %v699_v33 = vpop.f32.mrb[39].mxu0  ;;  %v6858_v52 = vld [vmem:[#allocation2 + $0x70] sm:$0xff]   ;;  %5562 = vmatprep.mubr.msk.bf16.mxu0 %vm1570_vm5, %v1529_v12  ;;  %v1542_v56 = vshll.u32 %v6853_v13, 16 }
 0x141   : > { %1277 = vst.msk [vmem:[#allocation2 + $0x84] sm:$0xf] %vm1243_vm3, %v5274_v15  ;;  %v762_v55 = vmax.f32 %v697_v49, 0.0  ;;  %v700_v20 = vadd.f32 %v6647_v50, %v699_v33  ;;  %v1534_v37 = vshll.u32 %v6858_v52, 16  ;;  %v6870_v38 = vld [vmem:[#allocation2 + $0x78] sm:$0xff]   ;;  %v1546_v0 = vshrl.u32 %v6853_v13, 16 }
 0x142   : > { %v1065_v48 = vmul.f32 %v6570_v18, %v764_v24  ;;  %v765_v10 = vmax.f32 %v708_v11, 0.0  ;;  %v1538_v18 = vshrl.u32 %v6858_v52, 16  ;;  %v1544_v40 = vrot.slane %v1542_v56, 1  ;;  %v1025_v11 = vpop.permute.xlu0 %1024 }
 0x143   : > { %v1063_v44 = vmul.f32 %v6566_v16, %v762_v55  ;;  %v763_v26 = vmax.f32 %v700_v20, 0.0  ;;  %v1536_v2 = vrot.slane %v1534_v37, 1 }
 0x144   : > { %v5279_v35 = vpack.c.bf16 %v1065_v48, %v1065_v48  ;;  %v1066_v39 = vmul.f32 %v1010_v60, %v765_v10  ;;  %v1548_v45 = vor.u32 %v1546_v0, %v1544_v40  ;;  %v5140_v60 = vld [vmem:[%s7933_s4 + $0xa] sm:$0x3] }
 0x145   : > { %v5277_v27 = vpack.c.bf16 %v1063_v44, %v1063_v44  ;;  %v1064_v3 = vmul.f32 %v6568_v17, %v763_v26  ;;  %v5534_v14 = vpop.f32.mrb[40].mxu0  ;;  %v1537_v4 = vsel %vm1421_vm4, %v1532_v63, %v1536_v2  ;;  %v1540_v9 = vor.u32 %v1538_v18, %v1536_v2  ;;  %v1020_v44 = vpop.permute.xlu1 %1019 }
 0x146   : > { %1282 = vst.msk [vmem:[#allocation2 + $0x98] sm:$0xf] %vm1243_vm3, %v5279_v35  ;;  %v5280_v16 = vpack.c.bf16 %v1066_v39, %v1066_v39  ;;  %v712_v28 = vpop.f32.mrb[41].mxu0  ;;  %5563 = vmatmul.mubr.msk.bf16.gmra.mrb[68].mxu0 %vm1570_vm5, %v1537_v4  ;;  %v6906_v39 = vld [vmem:[#allocation2 + $0x20] sm:$0xff]   ;;  %v2785_v4 = vrot.slane %v2783_v57, 1 }
 0x147   : > { %1280 = vst.msk [vmem:[#allocation2 + $0x90] sm:$0xf] %vm1243_vm3, %v5277_v27  ;;  %v5278_v8 = vpack.c.bf16 %v1064_v3, %v1064_v3  ;;  %v713_v5 = vadd.f32 %v6647_v50, %v712_v28  ;;  %v5535_v6 = vpop.f32.mrb[42].mxu0  ;;  %v6880_v15 = vld [vmem:[#allocation2 + $0x88] sm:$0xff]   ;;  %v1545_v49 = vsel %vm1421_vm4, %v1540_v9, %v1544_v40  ;;  %v7938_v50 = vrot.slane %v6870_v38, 1 }
 0x148   : > { %1283 = vst.msk [vmem:[#allocation2 + $0x9c] sm:$0xf] %vm1243_vm3, %v5280_v16  ;;  %v715_v17 = vpop.f32.mrb[43].mxu0  ;;  %v6884_v7 = vld [vmem:[#allocation2 + $0x80] sm:$0xff]   ;;  %5566 = vmatprep.mubr.msk.bf16.mxu0 %vm1570_vm5, %v1545_v49  ;;  %v2499_v12 = vrot.slane %v6880_v15, 1  ;;  %v6892_v55 = vld [vmem:[#allocation2 + $0x88] sm:$0xff]  }
 0x149   : > { %v6886_v24 = vld [vmem:[#allocation2 + $0x80] sm:$0xff]   ;;  %1281 = vst.msk [vmem:[#allocation2 + $0x94] sm:$0xf] %vm1243_vm3, %v5278_v8  ;;  %v766_v33 = vmax.f32 %v713_v5, 0.0  ;;  %v2497_v20 = vrot.slane %v6884_v7, 1  ;;  %v1558_v37 = vshll.u32 %v6892_v55, 16 }
 0x14a   : > { %v1550_v56 = vshll.u32 %v6886_v24, 16  ;;  %v1554_v10 = vshrl.u32 %v6886_v24, 16  ;;  %v2796_v3 = vrot.slane %v2794_v19, 2  ;;  %v2803_v40 = vshll.u32 %v6848_v23, 16  ;;  %v6933_v17 = vld [vmem:[#allocation2 + $0x28] sm:$0xff]  }
 0x14b   : > { %v1067_v48 = vmul.f32 %v1015_v59, %v766_v33  ;;  %v2498_v26 = vsel %vm2028_vm6, %v7938_v50, %v2497_v20  ;;  %v2500_v63 = vsel %vm2028_vm6, %v2497_v20, %v2499_v12  ;;  %v1560_v27 = vrot.slane %v1558_v37, 1 }
 0x14c   : > { %v1552_v35 = vrot.slane %v1550_v56, 1  ;;  %5680 = vmatprep.mubr.msk.bf16.mxu1 %vm1570_vm5, %v2498_v26  ;;  %v2788_v19 = vrot.slane %v2786_v62, 2  ;;  %v2802_v9 = vrot.slane %v2800_v58, 1  ;;  %v1562_v6 = vshrl.u32 %v6892_v55, 16 }
 0x14d   : > { %v5281_v0 = vpack.c.bf16 %v1067_v48, %v1067_v48  ;;  %v6241_v59 = vld [vmem:[#allocation2 + $0x98] ss:$0 sps:$4 sm:$0x11]   ;;  %5681 = vmatmul.mubr.msk.bf16.vlgmr.msra.gmra.mrb[0].mxu1 %vm1570_vm5, %v2500_v63  ;;  %v2797_v57 = vor.u32 %v2796_v3, %v6840_v31  ;;  %v2805_v49 = vrot.slane %v2803_v40, 2  ;;  %v2809_v11 = vshrl.u32 %v6906_v39, 16  ;;  %v6940_v48 = vld [vmem:[#allocation2 + $0x30] sm:$0xff]  }
 0x14e   : > { %v1553_v2 = vsel %vm1421_vm4, %v1548_v45, %v1552_v35  ;;  %v1556_v18 = vor.u32 %v1554_v10, %v1552_v35  ;;  %5689 = vmatpush3.bf16.msra.mxu1 %v6822_v47  ;;  %v6915_v14 = vld [vmem:[#allocation2 + $0x90] ss:$0 sps:$4 sm:$0x11]   ;;  %v2503_v5 = vrot.slane %v6241_v59, 1  ;;  %v2812_v33 = vshll.u32 %v6906_v39, 16  ;;  %v6953_v59 = vld [vmem:[#allocation2 + $0x38] sm:$0xff]  }
 0x14f   : > { %1284 = vst.msk [vmem:[#allocation2 + $0xa0] sm:$0xf] %vm1243_vm3, %v5281_v0  ;;  %5567 = vmatmul.mubr.msk.bf16.gmra.mrb[72].mxu0 %vm1570_vm5, %v1553_v2  ;;  %6175 = vmatprep.subr.msk.bf16.mxu1 %vm1625_vm2, %v5140_v60  ;;  %v1566_v47 = vshll.u32 %v6915_v14, 16  ;;  %v1564_v58 = vor.u32 %v1562_v6, %v1560_v27  ;;  %v2789_v56 = vor.u32 %v2788_v19, %v2785_v4  ;;  %v2811_v37 = vrot.slane %v2809_v11, 1  ;;  %v2022_v3 = vld [vmem:[#allocation2] sm:$0xe] }
 0x150   : > { %v1561_v16 = vsel %vm1421_vm4, %v1556_v18, %v1560_v27  ;;  %v6919_v28 = vld [vmem:[#allocation2 + $0x90] sm:$0xff]   ;;  %v2806_v44 = vor.u32 %v2805_v49, %v2802_v9  ;;  %v2818_v26 = vshrl.u32 %v6933_v17, 16  ;;  %v2821_v63 = vshll.u32 %v6933_v17, 16  ;;  %v6956_v27 = vld [vmem:[#allocation2 + $0x40] sm:$0xff]   ;;  %v6962_v6 = vld [vmem:[#allocation2 + $0x48] sm:$0xff]  }
 0x151   : > { %5570 = vmatprep.mubr.msk.bf16.mxu0 %vm1570_vm5, %v1561_v16  ;;  %v2501_v8 = vrot.slane %v6919_v28, 1  ;;  %v1568_v62 = vrot.slane %v1566_v47, 1  ;;  %v2798_v10 = vsel %vm2781_vm7, %v2789_v56, %v2797_v57  ;;  %v2827_v35 = vshrl.u32 %v6940_v48, 16  ;;  %v6280_v4 = vld [vmem:[#allocation2 + $0x4] sm:$0xf] }
 0x152   : > { %v2830_v0 = vshll.u32 %v6940_v48, 16  ;;  %v3321_v2 = vsel %vm1625_vm2, %v5140_v60, 0  ;;  %v2807_v40 = vsel %vm2781_vm7, %v2797_v57, %v2806_v44  ;;  %v2823_v16 = vrot.slane %v2821_v63, 2  ;;  %v6967_v60 = vld [vmem:[%s7933_s4 + $0xc] sm:$0x3] }
 0x153   : > { %v2502_v20 = vsel %vm2028_vm6, %v2499_v12, %v2501_v8  ;;  %v2504_v45 = vsel %vm2028_vm6, %v2501_v8, %v2503_v5  ;;  %v1569_v31 = vsel %vm1421_vm4, %v1564_v58, %v1568_v62  ;;  %v2814_v12 = vrot.slane %v2812_v33, 2  ;;  %v6969_v57 = vld [vmem:[#allocation2 + $0x8] sm:$0xff]   ;;  %v6976_v33 = vld [vmem:[#allocation2 + $0x50] sm:$0xff]  }
 0x154   : > { %5684 = vmatprep.mubr.msk.bf16.mxu1 %vm1570_vm5, %v2502_v20  ;;  %v5063_v19 = vcombine.low %v2022_v3, %v6280_v4  ;;  %v2829_v47 = vrot.slane %v2827_v35, 1  ;;  %v2832_v9 = vrot.slane %v2830_v0, 2  ;;  %v2836_v8 = vshrl.u32 %v6953_v59, 16  ;;  %v6282_v3 = vld [vmem:[%s7933_s4 + $0x6] sm:$0x3] }
 0x155   : > { %5685 = vmatmul.mubr.msk.bf16.gmra.mrb[4].mxu1 %vm1570_vm5, %v2504_v45  ;;  %v2815_v18 = vor.u32 %v2814_v12, %v2811_v37  ;;  %v2839_v5 = vshll.u32 %v6953_v59, 16  ;;  %v2845_v49 = vshrl.u32 %v6956_v27, 16  ;;  %v2848_v11 = vshll.u32 %v6956_v27, 16  ;;  %v6985_v12 = vld [vmem:[#allocation2 + $0x58] sm:$0xff]  }
 0x156   : > { %5690 = vmatprep.mubr.msk.bf16.mxu1 %vm1570_vm5, %v2798_v10  ;;  %v2833_v45 = vor.u32 %v2832_v9, %v2829_v47  ;;  %v2838_v58 = vrot.slane %v2836_v8, 1  ;;  %v2854_v10 = vshrl.u32 %v6962_v6, 16  ;;  %v2857_v37 = vshll.u32 %v6962_v6, 16  ;;  %v7005_v47 = vld [vmem:[#allocation2 + $0x18] sm:$0xff]  }
 0x157   : > { %5571 = vmatmul.mubr.msk.bf16.gmra.mrb[76].mxu0 %vm1570_vm5, %v1569_v31  ;;  %v2816_v62 = vsel %vm2781_vm7, %v2806_v44, %v2815_v18  ;;  %v2841_v56 = vrot.slane %v2839_v5, 2  ;;  %v2029_v31 = vrot.slane %v5063_v19, 1  ;;  %v7937_v44 = vrot.slane %v6969_v57, 1 }
 0x158   : > { %5576 = vmatprep.mubr.msk.bf16.mxu0 %vm1570_vm5, %v6675_v54  ;;  %v2820_v54 = vrot.slane %v2818_v26, 1  ;;  %v2121_v26 = vsel %vm1625_vm2, %v6750_v53, 0  ;;  %v2850_v63 = vrot.slane %v2848_v11, 2  ;;  %v2863_v35 = vshrl.u32 %v6976_v33, 16 }
 0x159   : > { %v2866_v0 = vshll.u32 %v6976_v33, 16  ;;  %v2859_v4 = vrot.slane %v2857_v37, 2  ;;  %v2872_v19 = vshrl.u32 %v6985_v12, 16  ;;  %v7023_v37 = vld [vmem:[#allocation2 + $0x70] sm:$0xff]  }
 0x15a   : > { %v2824_v20 = vor.u32 %v2823_v16, %v2820_v54  ;;  %v2842_v54 = vor.u32 %v2841_v56, %v2838_v58  ;;  %v2856_v16 = vrot.slane %v2854_v10, 1  ;;  %v2865_v8 = vrot.slane %v2863_v35, 1  ;;  %v7064_v11 = vld [vmem:[#allocation2 + $0x98] ss:$0 sps:$4 sm:$0x33]  }
 0x15b   : > { %v2868_v5 = vrot.slane %v2866_v0, 2  ;;  %v3244_v58 = vrot.slane %v6962_v6, 2  ;;  %v2874_v10 = vrot.slane %v2872_v19, 1 }
 0x15c   : > { %v2825_v53 = vsel %vm2781_vm7, %v2815_v18, %v2824_v20  ;;  %v7012_v18 = vld [vmem:[#allocation2 + $0x60] sm:$0xff]   ;;  %v2843_v56 = vsel %vm2781_vm7, %v2833_v45, %v2842_v54 }
 0x15d   : > { %5691 = vmatmul.mubr.msk.bf16.vlgmr.msra.gmra.mrb[8].mxu1 %vm1570_vm5, %v2807_v40  ;;  %v2834_v40 = vsel %vm2781_vm7, %v2824_v20, %v2833_v45  ;;  %v7936_v20 = vrot.slane %v6956_v27, 2  ;;  %v2881_v0 = vshrl.u32 %v7012_v18, 16  ;;  %v2884_v45 = vshll.u32 %v7012_v18, 16 }
 0x15e   : > { %5727 = vmatpush3.bf16.msra.mxu1 %v3321_v2  ;;  %5694 = vmatprep.mubr.msk.bf16.mxu1 %vm1570_vm5, %v2816_v62  ;;  %v6995_v2 = vsel %vm2028_vm6, %v2029_v31, %v7937_v44  ;;  %v7014_v62 = vld [vmem:[#allocation2 + $0x8] sm:$0xc]  ;;  %v2860_v31 = vor.u32 %v2859_v4, %v2856_v16  ;;  %v3250_v16 = vrot.slane %v7012_v18, 2  ;;  %v2902_v44 = vshll.u32 %v7023_v37, 16 }
 0x15f   : > { %5577 = vmatmul.mubr.msk.bf16.vlgmr.msra.gmra.mrb[44].mxu0 %vm1570_vm5, %v6969_v57  ;;  %6176 = vmatprep.subr.msk.bf16.mxu1 %vm1625_vm2, %v6967_v60  ;;  %v7033_v35 = vsel %vm3228_vm8, %v7936_v20, %v3244_v58 }
 0x160   : > { %5580 = vmatprep.mubr.msk.bf16.mxu0 %vm1570_vm5, %v6689_v22  ;;  %v2847_v22 = vrot.slane %v2845_v49, 1  ;;  %5613 = vmatpush3.bf16.msra.mxu0 %v2121_v26  ;;  %v7016_v49 = vld [vmem:[#allocation2 + $0x68] sm:$0xff]  }
 0x161   : > { %6172 = vmatprep.subr.msk.bf16.mxu0 %vm1625_vm2, %v6282_v3  ;;  %v3252_v4 = vrot.slane %v7016_v49, 2 }
 0x162   : > { %v2851_v9 = vor.u32 %v2850_v63, %v2847_v22  ;;  %v7027_v22 = vor.u32 %v2868_v5, %v2865_v8  ;;  %v2875_v63 = vshll.u32 %v6985_v12, 16  ;;  %v2899_v8 = vshrl.u32 %v7023_v37, 16 }
 0x164   : > { %v2852_v26 = vsel %vm2781_vm7, %v2842_v54, %v2851_v9  ;;  %v2893_v54 = vshll.u32 %v7016_v49, 16  ;;  %v2861_v19 = vsel %vm2781_vm7, %v2851_v9, %v2860_v31  ;;  %v2877_v20 = vrot.slane %v2875_v63, 2 }
 0x165   : > { %5695 = vmatmul.mubr.msk.bf16.gmra.mrb[12].mxu1 %vm1570_vm5, %v2825_v53  ;;  %v3248_v53 = vrot.slane %v6985_v12, 2  ;;  %v7060_v9 = vsel %vm3228_vm8, %v3250_v16, %v3252_v4 }
 0x166   : > { %5698 = vmatprep.mubr.msk.bf16.mxu1 %vm1570_vm5, %v2834_v40  ;;  %v2890_v40 = vshrl.u32 %v7016_v49, 16  ;;  %7949 = vst [vmem:[#allocation7_spill] sm:$0xff] %v7060_v9  ;;  %v2895_v29 = vrot.slane %v2893_v54, 2  ;;  %v2908_v9 = vshrl.u32 %v6870_v38, 16 }
 0x167   : > { %5581 = vmatmul.mubr.msk.bf16.gmra.mrb[48].mxu0 %vm1570_vm5, %v7005_v47  ;;  %v7057_v50 = vsel %vm3228_vm8, %v3248_v53, %v3250_v16  ;;  %v2901_v16 = vrot.slane %v2899_v8, 1 }
 0x168   : > { %5584 = vmatprep.mubr.msk.bf16.mxu0 %vm1570_vm5, %v6714_v21  ;;  %v3246_v21 = vrot.slane %v6976_v33, 2  ;;  %7948 = vst [vmem:[#allocation6_spill] sm:$0xff] %v7057_v50  ;;  %v2892_v63 = vrot.slane %v2890_v40, 1  ;;  %v3260_v50 = vrot.slane %v6880_v15, 2 }
 0x16a   : > { %v7038_v3 = vsel %vm3228_vm8, %v3244_v58, %v3246_v21  ;;  %v7049_v5 = vsel %vm3228_vm8, %v3246_v21, %v3248_v53  ;;  %v3254_v58 = vrot.slane %v7023_v37, 2  ;;  %v2886_v21 = vrot.slane %v2884_v45, 2 }
 0x16b   : > { %7946 = vst [vmem:[#allocation4_spill] sm:$0xff] %v7038_v3  ;;  %7947 = vst [vmem:[#allocation5_spill] sm:$0xff] %v7049_v5  ;;  %v3258_v53 = vrot.slane %v6884_v7, 2  ;;  %v2904_v45 = vrot.slane %v2902_v44, 2  ;;  %v3264_v5 = vrot.slane %v7064_v11, 2  ;;  %v2920_v44 = vshll.u32 %v6884_v7, 16 }
 0x16c   : > { %v2926_v3 = vshrl.u32 %v6880_v15, 16 }
 0x16d   : > { %5699 = vmatmul.mubr.msk.bf16.gmra.mrb[16].mxu1 %vm1570_vm5, %v2843_v56  ;;  %v2883_v56 = vrot.slane %v2881_v0, 1  ;;  %v3262_v0 = vrot.slane %v6919_v28, 2  ;;  %v7082_v40 = vsel %vm3228_vm8, %v3258_v53, %v3260_v50 }
 0x16e   : > { %5702 = vmatprep.mubr.msk.bf16.mxu1 %vm1570_vm5, %v2852_v26  ;;  %v3256_v26 = vrot.slane %v6870_v38, 2 }
 0x16f   : > { %5585 = vmatmul.mubr.msk.bf16.gmra.mrb[52].mxu0 %vm1570_vm5, %v6709_v30  ;;  %v7067_v30 = vsel %vm3228_vm8, %v3252_v4, %v3254_v58  ;;  %v2911_v4 = vshll.u32 %v6870_v38, 16  ;;  %v7085_v54 = vsel %vm3228_vm8, %v3260_v50, %v3262_v0  ;;  %v2870_v50 = vsel %vm2781_vm7, %v2860_v31, %v7027_v22  ;;  %v7110_v31 = vld [vmem:[#allocation2 + $0x14] sm:$0xf] }
 0x170   : > { %5588 = vmatprep.mubr.msk.bf16.mxu0 %vm1570_vm5, %v6737_v32  ;;  %7950 = vst [vmem:[#allocation8_spill] sm:$0xff] %v7067_v30  ;;  %v7074_v32 = vsel %vm3228_vm8, %v3254_v58, %v3256_v26  ;;  %v7079_v30 = vsel %vm3228_vm8, %v3256_v26, %v3258_v53  ;;  %7952 = vst [vmem:[#allocation10_spill] sm:$0xff] %v7085_v54  ;;  %v2064_v58 = vrot.slane %v6915_v14, 1  ;;  %v2929_v26 = vshll.u32 %v6880_v15, 16 }
 0x171   : > { %7951 = vst [vmem:[#allocation9_spill] sm:$0xff] %v7074_v32  ;;  %v2917_v32 = vshrl.u32 %v6884_v7, 16  ;;  %v2878_v53 = vor.u32 %v2877_v20, %v2874_v10  ;;  %v7098_v8 = vsel %vm3228_vm8, %v3262_v0, %v3264_v5  ;;  %v7954_v54 = vrot.slane %v6892_v55, 1  ;;  %7956 = vst [vmem:[#allocation13_spill] sm:$0xff] %v7110_v31 }
 0x172   : > { %7953 = vst [vmem:[#allocation11_spill] sm:$0xff] %v7098_v8  ;;  %v2887_v15 = vor.u32 %v2886_v21, %v2883_v56  ;;  %v2935_v7 = vshrl.u32 %v6919_v28, 16  ;;  %v2896_v20 = vor.u32 %v2895_v29, %v2892_v63  ;;  %v2905_v10 = vor.u32 %v2904_v45, %v2901_v16  ;;  %v3536_v8 = vld [vmem:[#allocation2 + $0x10] sm:$0xc] }
 0x173   : > { %v7103_v14 = vsel %vm2028_vm6, %v7954_v54, %v2064_v58  ;;  %v2910_v5 = vrot.slane %v2908_v9, 1  ;;  %v2913_v0 = vrot.slane %v2911_v4, 2  ;;  %v2919_v54 = vrot.slane %v2917_v32, 1 }
 0x174   : > { %7955 = vst [vmem:[#allocation12_spill] sm:$0xff] %v7103_v14  ;;  %v2922_v58 = vrot.slane %v2920_v44, 2  ;;  %v2928_v14 = vrot.slane %v2926_v3, 1  ;;  %v2879_v56 = vsel %vm2781_vm7, %v7027_v22, %v2878_v53  ;;  %v2944_v21 = vshrl.u32 %v7064_v11, 16 }
 0x175   : > { %5703 = vmatmul.mubr.msk.bf16.gmra.mrb[20].mxu1 %vm1570_vm5, %v2861_v19  ;;  %v2938_v19 = vshll.u32 %v6919_v28, 16  ;;  %v7957_v28 = vcombine.low %v7014_v62, %v6789_v41  ;;  %v2888_v29 = vsel %vm2781_vm7, %v2878_v53, %v2887_v15  ;;  %v2937_v9 = vrot.slane %v2935_v7, 1 }
 0x176   : > { %5706 = vmatprep.mubr.msk.bf16.mxu1 %vm1570_vm5, %v2870_v50  ;;  %v2947_v3 = vshll.u32 %v7064_v11, 16  ;;  %v2897_v16 = vsel %vm2781_vm7, %v2887_v15, %v2896_v20  ;;  %v2914_v32 = vor.u32 %v2913_v0, %v2910_v5  ;;  %v7940_v22 = vrot.slane %v6953_v59, 1  ;;  %v7168_v0 = vld [vmem:[#allocation2 + $0x10] sm:$0xff]  }
 0x177   : > { %5589 = vmatmul.mubr.msk.bf16.gmra.mrb[56].mxu0 %vm1570_vm5, %v6732_v36  ;;  %v2931_v36 = vrot.slane %v2929_v26, 2  ;;  %v3229_v50 = vrot.slane %v7957_v28, 2  ;;  %v2940_v63 = vrot.slane %v2938_v19, 2  ;;  %v2481_v45 = vrot.slane %v6956_v27, 1  ;;  %v7184_v28 = vld [vmem:[#allocation2 + $0x20] sm:$0xff]  }
 0x178   : > { %5592 = vmatprep.mubr.msk.bf16.mxu0 %vm1570_vm5, %v6768_v1  ;;  %v7121_v1 = vcombine.low %v3536_v8, %v7110_v31  ;;  %v2906_v4 = vsel %vm2781_vm7, %v2896_v20, %v2905_v10  ;;  %v2923_v41 = vor.u32 %v2922_v58, %v2919_v54  ;;  %v2483_v8 = vrot.slane %v6962_v6, 1 }
 0x179   : > { %v2932_v62 = vor.u32 %v2931_v36, %v2928_v14  ;;  %v2946_v44 = vrot.slane %v2944_v21, 1  ;;  %v3230_v26 = vrot.slane %v6807_v25, 2  ;;  %v7135_v11 = vsel %vm2028_vm6, %v7940_v22, %v2481_v45 }
 0x17a   : > { %v2485_v53 = vrot.slane %v6976_v33, 1  ;;  %v2941_v14 = vor.u32 %v2940_v63, %v2937_v9  ;;  %v2949_v15 = vrot.slane %v2947_v3, 2  ;;  %v7142_v6 = vsel %vm2028_vm6, %v2481_v45, %v2483_v8  ;;  %v7195_v9 = vld [vmem:[#allocation2 + $0x28] sm:$0xff]  }
 0x17b   : > { %v2487_v7 = vrot.slane %v6985_v12, 1  ;;  %v7148_v25 = vsel %vm2781_vm7, %v2905_v10, %v2914_v32  ;;  %v7942_v33 = vrot.slane %v6848_v23, 2  ;;  %v7156_v20 = vsel %vm2781_vm7, %v2914_v32, %v2923_v41 }
 0x17c   : > { %v7152_v19 = vsel %vm2028_vm6, %v2483_v8, %v2485_v53  ;;  %v7159_v5 = vsel %vm2781_vm7, %v2923_v41, %v2932_v62  ;;  %v7166_v10 = vsel %vm3228_vm8, %v3229_v50, %v3230_v26  ;;  %v7941_v54 = vrot.slane %v7168_v0, 1  ;;  %v7241_v41 = vld [vmem:[#allocation2 + $0x48] sm:$0xff]  }
 0x17d   : > { %5707 = vmatmul.mubr.msk.bf16.gmra.mrb[24].mxu1 %vm1570_vm5, %v2879_v56  ;;  %v7162_v12 = vsel %vm2028_vm6, %v2485_v53, %v2487_v7  ;;  %v2493_v36 = vrot.slane %v7023_v37, 1  ;;  %v7178_v56 = vsel %vm2781_vm7, %v2932_v62, %v2941_v14  ;;  %v2950_v21 = vor.u32 %v2949_v15, %v2946_v44  ;;  %v7210_v62 = vld [vmem:[#allocation2 + $0x30] sm:$0xff]   ;;  %v7227_v15 = vld [vmem:[#allocation2 + $0x20] sm:$0xff]  }
 0x17e   : > { %5710 = vmatprep.mubr.msk.bf16.mxu1 %vm1570_vm5, %v2888_v29  ;;  %v7192_v29 = vsel %vm3228_vm8, %v3230_v26, %v7942_v33  ;;  %v3983_v8 = vshrl.u32 %v7121_v1, 16  ;;  %v3986_v26 = vshll.u32 %v7121_v1, 16  ;;  %v7244_v37 = vld [vmem:[#allocation2 + $0x50] sm:$0xff]  }
 0x17f   : > { %5593 = vmatmul.mubr.msk.bf16.gmra.mrb[60].mxu0 %vm1570_vm5, %v6763_v42  ;;  %v2489_v42 = vrot.slane %v7012_v18, 1  ;;  %v7171_v18 = vld [vmem:[#allocation2 + $0x18] sm:$0xff]   ;;  %v7206_v32 = vsel %vm2781_vm7, %v2941_v14, %v2950_v21 }
 0x180   : > { %5596 = vmatprep.mubr.msk.bf16.mxu0 %vm1570_vm5, %v6794_v61  ;;  %v2491_v61 = vrot.slane %v7016_v49, 1  ;;  %v7182_v49 = vsel %vm1625_vm2, %v6967_v60, 0  ;;  %v7960_v60 = vrot.slane %v6870_v38, 1  ;;  %v7962_v38 = vrot.slane %v6969_v57, 1 }
 0x181   : > { %v7174_v58 = vsel %vm2028_vm6, %v2487_v7, %v2489_v42  ;;  %v3991_v53 = vshrl.u32 %v7171_v18, 16  ;;  %v3994_v14 = vshll.u32 %v7171_v18, 16  ;;  %v7230_v7 = vld [vmem:[#allocation2 + $0x38] sm:$0xff]   ;;  %v3985_v57 = vrot.slane %v3983_v8, 2 }
 0x182   : > { %v7187_v50 = vsel %vm2028_vm6, %v2489_v42, %v2491_v61  ;;  %v7198_v63 = vsel %vm2028_vm6, %v2491_v61, %v2493_v36  ;;  %v7203_v3 = vsel %vm2028_vm6, %v2493_v36, %v7960_v60  ;;  %v7219_v44 = vsel %vm2028_vm6, %v7962_v38, %v7941_v54  ;;  %v7236_v36 = vld [vmem:[#allocation2 + $0x40] sm:$0xff]  }
 0x183   : > { %7958 = vst [vmem:[#allocation14_spill] sm:$0xff] %v7187_v50  ;;  %7959 = vst [vmem:[#allocation15_spill] sm:$0xff] %v7198_v63  ;;  %v4000_v42 = vshrl.u32 %v7184_v28, 16  ;;  %v4003_v61 = vshll.u32 %v7184_v28, 16  ;;  %v3988_v21 = vrot.slane %v3986_v26, 3  ;;  %v3996_v60 = vrot.slane %v3994_v14, 3 }
 0x184   : > { %7961 = vst [vmem:[#allocation16_spill] sm:$0xff] %v7203_v3  ;;  %v4018_v8 = vshrl.u32 %v7210_v62, 16  ;;  %v4027_v31 = vshrl.u32 %v7230_v7, 16  ;;  %v4030_v3 = vshll.u32 %v7230_v7, 16  ;;  %v4036_v63 = vshrl.u32 %v7236_v36, 16 }
 0x185   : > { %5711 = vmatmul.mubr.msk.bf16.gmra.mrb[28].mxu1 %vm1570_vm5, %v2897_v16  ;;  %v4002_v38 = vrot.slane %v4000_v42, 2  ;;  %v4005_v22 = vrot.slane %v4003_v61, 3  ;;  %v4012_v16 = vshll.u32 %v7195_v9, 16  ;;  %v3989_v54 = vor.u32 %v3988_v21, %v3985_v57  ;;  %v7252_v57 = vld [vmem:[#allocation2 + $0x58] sm:$0xff]  }
 0x186   : > { %5714 = vmatprep.mubr.msk.bf16.mxu1 %vm1570_vm5, %v2906_v4  ;;  %v4009_v4 = vshrl.u32 %v7195_v9, 16  ;;  %v4020_v14 = vrot.slane %v4018_v8, 2  ;;  %v4045_v8 = vshrl.u32 %v7241_v41, 16 }
 0x187   : > { %5597 = vmatmul.mubr.msk.bf16.gmra.mrb[64].mxu0 %vm1570_vm5, %v6787_v46  ;;  %v3993_v46 = vrot.slane %v3991_v53, 2  ;;  %v4006_v26 = vor.u32 %v4005_v22, %v4002_v38  ;;  %v4014_v53 = vrot.slane %v4012_v16, 3  ;;  %v4039_v22 = vshll.u32 %v7236_v36, 16  ;;  %v7260_v16 = vld [vmem:[#allocation2 + $0x60] sm:$0xff]  }
 0x188   : > { %5600 = vmatprep.mubr.msk.bf16.mxu0 %vm1570_vm5, %v6828_v43  ;;  %v4011_v33 = vrot.slane %v4009_v4, 2  ;;  %v4021_v43 = vshll.u32 %v7210_v62, 16  ;;  %v4032_v4 = vrot.slane %v4030_v3, 3  ;;  %v4038_v38 = vrot.slane %v4036_v63, 2  ;;  %v7274_v63 = vld [vmem:[#allocation2 + $0x68] sm:$0xff]  }
 0x189   : > { %v3997_v45 = vor.u32 %v3996_v60, %v3993_v46  ;;  %v4029_v60 = vrot.slane %v4027_v31, 2  ;;  %v4084_v50 = vshll.u32 %v7274_v63, 16 }
 0x18a   : > { %v4023_v61 = vrot.slane %v4021_v43, 3  ;;  %v4015_v46 = vor.u32 %v4014_v53, %v4011_v33  ;;  %v4041_v33 = vrot.slane %v4039_v22, 3  ;;  %v4047_v43 = vrot.slane %v4045_v8, 2  ;;  %v7280_v53 = vld [vmem:[#allocation2 + $0x70] sm:$0xff]  }
 0x18b   : > { %v7248_v42 = vsel %vm3981_vm9, %v3989_v54, %v3997_v45  ;;  %v7255_v21 = vsel %vm3981_vm9, %v3997_v45, %v4006_v26  ;;  %v4048_v45 = vshll.u32 %v7241_v41, 16  ;;  %v4063_v22 = vshrl.u32 %v7252_v57, 16 }
 0x18c   : > { %7963 = vst [vmem:[#allocation17_spill] sm:$0xff] %v7248_v42  ;;  %7964 = vst [vmem:[#allocation18_spill] sm:$0xff] %v7255_v21  ;;  %v4024_v54 = vor.u32 %v4023_v61, %v4020_v14  ;;  %v7268_v31 = vsel %vm3981_vm9, %v4006_v26, %v4015_v46  ;;  %v4042_v26 = vor.u32 %v4041_v33, %v4038_v38  ;;  %v4066_v21 = vshll.u32 %v7252_v57, 16  ;;  %v7294_v33 = vld [vmem:[#allocation2 + $0x80] sm:$0xff]  }
 0x18d   : > { %5715 = vmatmul.mubr.msk.bf16.gmra.mrb[32].mxu1 %vm1570_vm5, %v7148_v25  ;;  %7965 = vst [vmem:[#allocation19_spill] sm:$0xff] %v7268_v31  ;;  %v4054_v25 = vshrl.u32 %v7244_v37, 16  ;;  %v4050_v14 = vrot.slane %v4048_v45, 3  ;;  %v4065_v8 = vrot.slane %v4063_v22, 2  ;;  %v4075_v38 = vshll.u32 %v7260_v16, 16 }
 0x18e   : > { %5718 = vmatprep.mubr.msk.bf16.mxu1 %vm1570_vm5, %v7156_v20  ;;  %v7277_v3 = vsel %vm3981_vm9, %v4015_v46, %v4024_v54  ;;  %v4057_v20 = vshll.u32 %v7244_v37, 16  ;;  %v4072_v46 = vshrl.u32 %v7260_v16, 16  ;;  %v4093_v22 = vshll.u32 %v7280_v53, 16 }
 0x18f   : > { %5601 = vmatmul.mubr.msk.bf16.gmra.mrb[68].mxu0 %vm1570_vm5, %v6818_v51  ;;  %7966 = vst [vmem:[#allocation20_spill] sm:$0xff] %v7277_v3  ;;  %v4033_v51 = vor.u32 %v4032_v4, %v4029_v60  ;;  %v4056_v61 = vrot.slane %v4054_v25, 2  ;;  %v7288_v3 = vld [vmem:[#allocation2 + $0x78] sm:$0xff]   ;;  %v4051_v4 = vor.u32 %v4050_v14, %v4047_v43  ;;  %v4068_v25 = vrot.slane %v4066_v21, 3  ;;  %v7304_v43 = vld [vmem:[#allocation2 + $0x88] sm:$0xff]  }
 0x190   : > { %5604 = vmatprep.mubr.msk.bf16.mxu0 %vm1570_vm5, %v6858_v52  ;;  %v4059_v52 = vrot.slane %v4057_v20, 3  ;;  %v4081_v20 = vshrl.u32 %v7274_v63, 16  ;;  %v4077_v42 = vrot.slane %v4075_v38, 3  ;;  %v4099_v38 = vshrl.u32 %v7288_v3, 16 }
 0x191   : > { %v7284_v31 = vsel %vm3981_vm9, %v4024_v54, %v4033_v51  ;;  %v7291_v60 = vsel %vm3981_vm9, %v4033_v51, %v4042_v26  ;;  %v4074_v54 = vrot.slane %v4072_v46, 2  ;;  %v4090_v51 = vshrl.u32 %v7280_v53, 16 }
 0x192   : > { %7967 = vst [vmem:[#allocation21_spill] sm:$0xff] %v7284_v31  ;;  %7968 = vst [vmem:[#allocation22_spill] sm:$0xff] %v7291_v60  ;;  %v4060_v45 = vor.u32 %v4059_v52, %v4056_v61  ;;  %v7298_v31 = vsel %vm3981_vm9, %v4042_v26, %v4051_v4  ;;  %v4069_v21 = vor.u32 %v4068_v25, %v4065_v8  ;;  %v4083_v61 = vrot.slane %v4081_v20, 2  ;;  %v7314_v26 = vld [vmem:[#allocation2 + $0x90] sm:$0xff]   ;;  %v7324_v20 = vld [vmem:[#allocation2 + $0x98] sm:$0xff]  }
 0x193   : > { %7969 = vst [vmem:[#allocation23_spill] sm:$0xff] %v7298_v31  ;;  %v4078_v52 = vor.u32 %v4077_v42, %v4074_v54  ;;  %v4086_v46 = vrot.slane %v4084_v50, 3  ;;  %v4095_v8 = vrot.slane %v4093_v22, 3  ;;  %v4102_v25 = vshll.u32 %v7288_v3, 16 }
 0x194   : > { %v7307_v14 = vsel %vm3981_vm9, %v4051_v4, %v4060_v45  ;;  %v7320_v4 = vsel %vm3981_vm9, %v4060_v45, %v4069_v21  ;;  %v4101_v42 = vrot.slane %v4099_v38, 2  ;;  %v4111_v54 = vshll.u32 %v7294_v33, 16 }
 0x195   : > { %5719 = vmatmul.mubr.msk.bf16.gmra.mrb[0].mxu1 %vm1570_vm5, %v7159_v5  ;;  %7970 = vst [vmem:[#allocation24_spill] sm:$0xff] %v7307_v14  ;;  %v4092_v5 = vrot.slane %v4090_v51, 2  ;;  %7971 = vst [vmem:[#allocation25_spill] sm:$0xff] %v7320_v4  ;;  %v4087_v50 = vor.u32 %v4086_v46, %v4083_v61  ;;  %v4104_v14 = vrot.slane %v4102_v25, 3  ;;  %v4117_v45 = vshrl.u32 %v7304_v43, 16 }
 0x196   : > { %5722 = vmatprep.mubr.msk.bf16.mxu1 %vm1570_vm5, %v7178_v56  ;;  %v7327_v56 = vsel %vm3981_vm9, %v4069_v21, %v4078_v52  ;;  %v7331_v4 = vld [vmem:[#allocation2 + $0xa0] ss:$0 sps:$4 sm:$0x77]   ;;  %v4113_v31 = vrot.slane %v4111_v54, 3  ;;  %v4120_v60 = vshll.u32 %v7304_v43, 16  ;;  %v4126_v21 = vshrl.u32 %v7314_v26, 16 }
 0x197   : > { %5605 = vmatmul.mubr.msk.bf16.gmra.mrb[72].mxu0 %vm1570_vm5, %v6853_v13  ;;  %v4108_v13 = vshrl.u32 %v7294_v33, 16  ;;  %7972 = vst [vmem:[#allocation26_spill] sm:$0xff] %v7327_v56  ;;  %v4096_v51 = vor.u32 %v4095_v8, %v4092_v5  ;;  %v7334_v22 = vsel %vm3981_vm9, %v4078_v52, %v4087_v50  ;;  %v4105_v46 = vor.u32 %v4104_v14, %v4101_v42 }
 0x198   : > { %5608 = vmatprep.mubr.msk.bf16.mxu0 %vm1570_vm5, %v6886_v24  ;;  %7973 = vst [vmem:[#allocation27_spill] sm:$0xff] %v7334_v22  ;;  %v4119_v38 = vrot.slane %v4117_v45, 2  ;;  %v4129_v5 = vshll.u32 %v7314_v26, 16  ;;  %v4122_v25 = vrot.slane %v4120_v60, 3  ;;  %v4135_v56 = vshrl.u32 %v7324_v20, 16 }
 0x199   : > { %v4110_v24 = vrot.slane %v4108_v13, 2  ;;  %v7339_v61 = vsel %vm3981_vm9, %v4087_v50, %v4096_v51  ;;  %v4128_v13 = vrot.slane %v4126_v21, 2  ;;  %v7346_v52 = vsel %vm3981_vm9, %v4096_v51, %v4105_v46 }
 0x19a   : > { %v4131_v54 = vrot.slane %v4129_v5, 3  ;;  %v4138_v22 = vshll.u32 %v7324_v20, 16  ;;  %v4144_v50 = vshrl.u32 %v7331_v4, 16  ;;  %v4123_v60 = vor.u32 %v4122_v25, %v4119_v38 }
 0x19b   : > { %v4114_v8 = vor.u32 %v4113_v31, %v4110_v24  ;;  %v4137_v14 = vrot.slane %v4135_v56, 2  ;;  %v7974_v21 = vrot.slane %v6906_v39, 2  ;;  %v7975_v5 = vrot.slane %v6848_v23, 2 }
 0x19c   : > { %v4132_v51 = vor.u32 %v4131_v54, %v4128_v13  ;;  %v4140_v24 = vrot.slane %v4138_v22, 3  ;;  %v4146_v45 = vrot.slane %v4144_v50, 2  ;;  %v7944_v25 = vrot.slane %v7171_v18, 3 }
 0x19d   : > { %5723 = vmatmul.mubr.msk.bf16.gmra.mrb[4].mxu1 %vm1570_vm5, %v7206_v32  ;;  %v7355_v31 = vsel %vm3981_vm9, %v4105_v46, %v4114_v8  ;;  %v4147_v32 = vshll.u32 %v7331_v4, 16  ;;  %v7367_v46 = vsel %vm3981_vm9, %v4114_v8, %v4123_v60  ;;  %v4432_v22 = vrot.slane %v7184_v28, 3 }
 0x19e   : > { %5728 = vmatprep.mubr.msk.bf16.mxu1 %vm1570_vm5, %v7166_v10  ;;  %v3235_v10 = vsel %vm3228_vm8, %v7975_v5, %v7974_v21  ;;  %v7370_v38 = vsel %vm3981_vm9, %v4123_v60, %v4132_v51  ;;  %v4434_v54 = vrot.slane %v7195_v9, 3  ;;  %v4436_v23 = vrot.slane %v7210_v62, 3 }
 0x19f   : > { %5609 = vmatmul.mubr.msk.bf16.gmra.mrb[76].mxu0 %vm1570_vm5, %v6892_v55  ;;  %v4149_v56 = vrot.slane %v4147_v32, 3  ;;  %v4438_v50 = vrot.slane %v7230_v7, 3  ;;  %v7976_v8 = vrot.slane %v7005_v47, 1  ;;  %v7977_v32 = vrot.slane %v7168_v0, 1 }
 0x1a0   : > { %5614 = vmatprep.mubr.msk.bf16.mxu0 %vm1570_vm5, %v6995_v2  ;;  %v4141_v2 = vor.u32 %v4140_v24, %v4137_v14  ;;  %v7388_v14 = vsel %vm4428_vm10, %v7944_v25, %v4432_v22  ;;  %v4440_v24 = vrot.slane %v7236_v36, 3  ;;  %v7395_v5 = vsel %vm4428_vm10, %v4432_v22, %v4434_v54 }
 0x1a1   : > { %v4150_v13 = vor.u32 %v4149_v56, %v4146_v45  ;;  %v2035_v21 = vsel %vm2028_vm6, %v7977_v32, %v7976_v8  ;;  %v7398_v0 = vsel %vm4428_vm10, %v4434_v54, %v4436_v23  ;;  %v7401_v56 = vsel %vm4428_vm10, %v4436_v23, %v4438_v50 }
 0x1a2   : > { %v7383_v60 = vsel %vm3981_vm9, %v4132_v51, %v4141_v2  ;;  %v7408_v51 = vld [vmem:[%s7933_s4 + $0xe] sm:$0x3]  ;;  %v4442_v22 = vrot.slane %v7241_v41, 3  ;;  %v4446_v54 = vrot.slane %v7252_v57, 3  ;;  %v4450_v23 = vrot.slane %v7274_v63, 3 }
 0x1a3   : > { %v7392_v45 = vsel %vm3981_vm9, %v4141_v2, %v4150_v13  ;;  %v7411_v2 = vsel %vm4428_vm10, %v4438_v50, %v4440_v24  ;;  %v4444_v13 = vrot.slane %v7244_v37, 3  ;;  %v4452_v8 = vrot.slane %v7280_v53, 3 }
 0x1a4   : > { %v4454_v50 = vrot.slane %v7288_v3, 3  ;;  %v7426_v32 = vsel %vm4428_vm10, %v4440_v24, %v4442_v22  ;;  %v4456_v25 = vrot.slane %v7294_v33, 3 }
 0x1a5   : > { %5729 = vmatmul.mubr.msk.bf16.vlgmr.msra.gmra.mrb[8].mxu1 %vm1570_vm5, %v7192_v29  ;;  %v4448_v29 = vrot.slane %v7260_v16, 3  ;;  %v7445_v24 = vsel %vm4428_vm10, %v4450_v23, %v4452_v8 }
 0x1a6   : > { %5765 = vmatpush3.bf16.msra.mxu1 %v7182_v49  ;;  %5732 = vmatprep.mubr.msk.bf16.mxu1 %vm1570_vm5, %v3235_v10  ;;  %v7429_v49 = vsel %vm4428_vm10, %v4442_v22, %v4444_v13  ;;  %7981 = vst [vmem:[#allocation31_spill] sm:$0xff] %v7445_v24  ;;  %v4458_v22 = vrot.slane %v7304_v43, 3  ;;  %v7452_v42 = vsel %vm4428_vm10, %v4454_v50, %v4456_v25 }
 0x1a7   : > { %5615 = vmatmul.mubr.msk.bf16.vlgmr.msra.gmra.mrb[44].mxu0 %vm1570_vm5, %v7219_v44  ;;  %v7432_v44 = vsel %vm4428_vm10, %v4444_v13, %v4446_v54  ;;  %6177 = vmatprep.subr.msk.bf16.mxu1 %vm1625_vm2, %v7408_v51  ;;  %v7439_v10 = vsel %vm4428_vm10, %v4446_v54, %v4448_v29  ;;  %v7449_v13 = vsel %vm4428_vm10, %v4452_v8, %v4454_v50  ;;  %v6286_v54 = vld [vmem:[#allocation2 + $0x28] sm:$0xff]   ;;  %v7985_v50 = vrot.slane %v6933_v17, 2 }
 0x1a8   : > { %5618 = vmatprep.mubr.msk.bf16.mxu0 %vm1570_vm5, %v2035_v21  ;;  %7978 = vst [vmem:[#allocation28_spill] sm:$0xff] %v7432_v44  ;;  %5651 = vmatpush3.bf16.msra.mxu0 %v6601_v34  ;;  %7979 = vst [vmem:[#allocation29_spill] sm:$0xff] %v7439_v10  ;;  %v7442_v21 = vsel %vm4428_vm10, %v4448_v29, %v4450_v23  ;;  %v4460_v34 = vrot.slane %v7314_v26, 3  ;;  %v4462_v44 = vrot.slane %v7324_v20, 3  ;;  %v2038_v10 = vrot.slane %v6286_v54, 1 }
 0x1a9   : > { %7980 = vst [vmem:[#allocation30_spill] sm:$0xff] %v7442_v21  ;;  %7982 = vst [vmem:[#allocation32_spill] sm:$0xff] %v7449_v13  ;;  %v7457_v29 = vsel %vm4428_vm10, %v4456_v25, %v4458_v22  ;;  %v4464_v23 = vrot.slane %v7331_v4, 3  ;;  %v7987_v25 = vrot.slane %v7227_v15, 1  ;;  %v7988_v4 = vrot.slane %v7005_v47, 1 }
 0x1aa   : > { %7983 = vst [vmem:[#allocation33_spill] sm:$0xff] %v7452_v42  ;;  %v7461_v24 = vsel %vm4428_vm10, %v4458_v22, %v4460_v34  ;;  %v7464_v8 = vsel %vm4428_vm10, %v4460_v34, %v4462_v44  ;;  %v7986_v42 = vrot.slane %v6906_v39, 2  ;;  %v7989_v34 = vrot.slane %v6940_v48, 2 }
 0x1ab   : > { %7984 = vst [vmem:[#allocation34_spill] sm:$0xff] %v7464_v8  ;;  %v7472_v21 = vsel %vm4428_vm10, %v4462_v44, %v4464_v23  ;;  %v2037_v22 = vsel %vm2028_vm6, %v7988_v4, %v7987_v25  ;;  %v7990_v54 = vmov %v7985_v50  ;;  %v7991_v39 = vmov %v7987_v25  ;;  %v6287_v44 = vld [vmem:[#allocation2 + $0x30] sm:$0xff]   ;;  %v6288_v23 = vld [vmem:[#allocation2 + $0x38] sm:$0xff]  }
 0x1ac   : > { %v3237_v13 = vsel %vm3228_vm8, %v7986_v42, %v7985_v50  ;;  %v3239_v8 = vsel %vm3228_vm8, %v7990_v54, %v7989_v34  ;;  %v2039_v42 = vsel %vm2028_vm6, %v7991_v39, %v2038_v10  ;;  %v3240_v47 = vrot.slane %v6953_v59, 2  ;;  %v6289_v54 = vld [vmem:[#allocation2 + $0x40] sm:$0xff]  }
 0x1ad   : > { %5733 = vmatmul.mubr.msk.bf16.gmra.mrb[12].mxu1 %vm1570_vm5, %v3237_v13  ;;  %v2040_v13 = vrot.slane %v6287_v44, 1  ;;  %v2042_v50 = vrot.slane %v6288_v23, 1  ;;  %v7992_v25 = vmov %v7989_v34  ;;  %v7993_v15 = vrot.slane %v6956_v27, 2  ;;  %v7994_v27 = vld [vmem:[#allocation4_spill] sm:$0xff] }
 0x1ae   : > { %5736 = vmatprep.mubr.msk.bf16.mxu1 %vm1570_vm5, %v3239_v8  ;;  %v3241_v4 = vsel %vm3228_vm8, %v7992_v25, %v3240_v47  ;;  %v2044_v39 = vrot.slane %v6289_v54, 1  ;;  %v6292_v25 = vld [vmem:[#allocation2 + $0x58] sm:$0xff]   ;;  %v6294_v54 = vld [vmem:[#allocation2 + $0x68] sm:$0xff]  }
 0x1af   : > { %5619 = vmatmul.mubr.msk.bf16.gmra.mrb[48].mxu0 %vm1570_vm5, %v2037_v22  ;;  %v2041_v8 = vsel %vm2028_vm6, %v2038_v10, %v2040_v13  ;;  %v3243_v22 = vsel %vm3228_vm8, %v3240_v47, %v7993_v15  ;;  %v2043_v34 = vsel %vm2028_vm6, %v2040_v13, %v2042_v50  ;;  %v6291_v13 = vld [vmem:[#allocation2 + $0x50] sm:$0xff]  }
 0x1b0   : > { %5622 = vmatprep.mubr.msk.bf16.mxu0 %vm1570_vm5, %v2039_v42  ;;  %v6290_v42 = vld [vmem:[#allocation2 + $0x48] sm:$0xff]   ;;  %v2045_v10 = vsel %vm2028_vm6, %v2042_v50, %v2044_v39  ;;  %v2048_v23 = vrot.slane %v6291_v13, 1 }
 0x1b1   : > { %v2046_v44 = vrot.slane %v6290_v42, 1  ;;  %v7996_v50 = vld [vmem:[#allocation6_spill] sm:$0xff]  ;;  %v7997_v42 = vld [vmem:[#allocation7_spill] sm:$0xff] }
 0x1b3   : > { %v2047_v47 = vsel %vm2028_vm6, %v2044_v39, %v2046_v44  ;;  %v2054_v39 = vrot.slane %v6294_v54, 1  ;;  %v8001_v54 = vrot.slane %v6892_v55, 1 }
 0x1b5   : > { %5737 = vmatmul.mubr.msk.bf16.gmra.mrb[16].mxu1 %vm1570_vm5, %v3241_v4  ;;  %v2050_v4 = vrot.slane %v6292_v25, 1 }
 0x1b6   : > { %5740 = vmatprep.mubr.msk.bf16.mxu1 %vm1570_vm5, %v3243_v22  ;;  %v6293_v22 = vld [vmem:[#allocation2 + $0x60] sm:$0xff]  }
 0x1b7   : > { %5623 = vmatmul.mubr.msk.bf16.gmra.mrb[52].mxu0 %vm1570_vm5, %v2041_v8  ;;  %v7995_v8 = vld [vmem:[#allocation5_spill] sm:$0xff]  ;;  %v2051_v15 = vsel %vm2028_vm6, %v2048_v23, %v2050_v4 }
 0x1b8   : > { %5626 = vmatprep.mubr.msk.bf16.mxu0 %vm1570_vm5, %v2043_v34  ;;  %v2052_v34 = vrot.slane %v6293_v22, 1 }
 0x1bd   : > { %5741 = vmatmul.mubr.msk.bf16.gmra.mrb[20].mxu1 %vm1570_vm5, %v7033_v35  ;;  %v2049_v35 = vsel %vm2028_vm6, %v2046_v44, %v2048_v23  ;;  %v7998_v44 = vld [vmem:[#allocation8_spill] sm:$0xff] }
 0x1be   : > { %5744 = vmatprep.mubr.msk.bf16.mxu1 %vm1570_vm5, %v7994_v27  ;;  %v2055_v27 = vsel %vm2028_vm6, %v2052_v34, %v2054_v39  ;;  %v6296_v23 = vld [vmem:[#allocation2 + $0x78] sm:$0xff]  }
 0x1bf   : > { %5627 = vmatmul.mubr.msk.bf16.gmra.mrb[56].mxu0 %vm1570_vm5, %v2045_v10  ;;  %v2053_v10 = vsel %vm2028_vm6, %v2050_v4, %v2052_v34  ;;  %v2058_v25 = vrot.slane %v6296_v23, 1  ;;  %v8000_v34 = vld [vmem:[#allocation10_spill] sm:$0xff]  ;;  %v8004_v23 = vld [vmem:[#allocation12_spill] sm:$0xff] }
 0x1c0   : > { %5630 = vmatprep.mubr.msk.bf16.mxu0 %vm1570_vm5, %v2047_v47  ;;  %v6295_v47 = vld [vmem:[#allocation2 + $0x70] sm:$0xff]  }
 0x1c1   : > { %v2056_v13 = vrot.slane %v6295_v47, 1  ;;  %v8003_v47 = vld [vmem:[#allocation11_spill] sm:$0xff] }
 0x1c3   : > { %v2059_v4 = vsel %vm2028_vm6, %v2056_v13, %v2058_v25 }
 0x1c5   : > { %5745 = vmatmul.mubr.msk.bf16.gmra.mrb[24].mxu1 %vm1570_vm5, %v7995_v8  ;;  %v7999_v8 = vld [vmem:[#allocation9_spill] sm:$0xff] }
 0x1c6   : > { %5748 = vmatprep.mubr.msk.bf16.mxu1 %vm1570_vm5, %v7996_v50  ;;  %v6297_v50 = vld [vmem:[#allocation2 + $0x80] sm:$0xff]  }
 0x1c7   : > { %5631 = vmatmul.mubr.msk.bf16.gmra.mrb[60].mxu0 %vm1570_vm5, %v2049_v35  ;;  %v2057_v35 = vsel %vm2028_vm6, %v2054_v39, %v2056_v13  ;;  %v3668_v39 = vrot.slane %v7121_v1, 2  ;;  %v3671_v1 = vrot.slane %v7184_v28, 2 }
 0x1c8   : > { %5634 = vmatprep.mubr.msk.bf16.mxu0 %vm1570_vm5, %v2051_v15  ;;  %v2060_v15 = vrot.slane %v6297_v50, 1 }
 0x1ca   : > { %v2061_v22 = vsel %vm2028_vm6, %v2058_v25, %v2060_v15  ;;  %v6299_v25 = vld [vmem:[#allocation2 + $0x18] sm:$0xff]  }
 0x1cd   : > { %5749 = vmatmul.mubr.msk.bf16.gmra.mrb[28].mxu1 %vm1570_vm5, %v7997_v42  ;;  %v6298_v42 = vld [vmem:[#allocation2 + $0x10] sm:$0xff]  }
 0x1ce   : > { %5752 = vmatprep.mubr.msk.bf16.mxu1 %vm1570_vm5, %v7998_v44  ;;  %v3669_v44 = vrot.slane %v7171_v18, 2 }
 0x1cf   : > { %5635 = vmatmul.mubr.msk.bf16.gmra.mrb[64].mxu0 %vm1570_vm5, %v2053_v10  ;;  %v2469_v10 = vrot.slane %v6298_v42, 1  ;;  %v2477_v42 = vrot.slane %v6940_v48, 1  ;;  %v3681_v48 = vrot.slane %v7241_v41, 2  ;;  %v3685_v41 = vrot.slane %v7252_v57, 2 }
 0x1d0   : > { %5638 = vmatprep.mubr.msk.bf16.mxu0 %vm1570_vm5, %v2055_v27  ;;  %v3670_v13 = vsel %vm3228_vm8, %v3668_v39, %v3669_v44  ;;  %v3677_v39 = vrot.slane %v7230_v7, 2 }
 0x1d5   : > { %5753 = vmatmul.mubr.msk.bf16.gmra.mrb[32].mxu1 %vm1570_vm5, %v7999_v8  ;;  %v2471_v8 = vrot.slane %v6299_v25, 1 }
 0x1d6   : > { %5756 = vmatprep.mubr.msk.bf16.mxu1 %vm1570_vm5, %v7079_v30  ;;  %v2063_v30 = vsel %vm2028_vm6, %v2060_v15, %v8001_v54  ;;  %v4207_v15 = vsel %vm1625_vm2, %v7408_v51, 0  ;;  %v7567_v54 = vld [vmem:[%s7933_s4 + $0x10] sm:$0x3]  ;;  %v3675_v51 = vrot.slane %v7210_v62, 2 }
 0x1d7   : > { %5639 = vmatmul.mubr.msk.bf16.gmra.mrb[68].mxu0 %vm1570_vm5, %v2057_v35  ;;  %v3673_v35 = vrot.slane %v7195_v9, 2 }
 0x1d8   : > { %5642 = vmatprep.mubr.msk.bf16.mxu0 %vm1570_vm5, %v2059_v4  ;;  %v6300_v4 = vld [vmem:[#allocation2 + $0x20] sm:$0xff]  }
 0x1d9   : > { %v2473_v50 = vrot.slane %v6300_v4, 1  ;;  %v3674_v28 = vsel %vm3228_vm8, %v3671_v1, %v3673_v35  ;;  %v3701_v4 = vrot.slane %v7324_v20, 2  ;;  %v8010_v20 = vld [vmem:[#allocation18_spill] sm:$0xff] }
 0x1db   : > { %v2474_v9 = vsel %vm2028_vm6, %v2471_v8, %v2473_v50 }
 0x1dd   : > { %5757 = vmatmul.mubr.msk.bf16.gmra.mrb[0].mxu1 %vm1570_vm5, %v7082_v40  ;;  %v8002_v40 = vld [vmem:[#allocation3_spill] sm:$0xff] }
 0x1de   : > { %5760 = vmatprep.mubr.msk.bf16.mxu1 %vm1570_vm5, %v8000_v34  ;;  %v2468_v27 = vrot.slane %v8002_v40, 1  ;;  %v2472_v34 = vsel %vm2028_vm6, %v2469_v10, %v2471_v8  ;;  %v3678_v40 = vsel %vm3228_vm8, %v3675_v51, %v3677_v39  ;;  %v8008_v8 = vld [vmem:[#allocation16_spill] sm:$0xff] }
 0x1df   : > { %5643 = vmatmul.mubr.msk.bf16.gmra.mrb[72].mxu0 %vm1570_vm5, %v2061_v22  ;;  %v3672_v22 = vsel %vm3228_vm8, %v3669_v44, %v3671_v1  ;;  %v8006_v1 = vld [vmem:[#allocation14_spill] sm:$0xff] }
 0x1e0   : > { %5646 = vmatprep.mubr.msk.bf16.mxu0 %vm1570_vm5, %v2063_v30  ;;  %v2470_v55 = vsel %vm2028_vm6, %v2468_v27, %v2469_v10  ;;  %v2475_v30 = vrot.slane %v6933_v17, 1  ;;  %v3676_v10 = vsel %vm3228_vm8, %v3673_v35, %v3675_v51  ;;  %v3679_v17 = vrot.slane %v7236_v36, 2  ;;  %v8013_v51 = vld [vmem:[#allocation21_spill] sm:$0xff] }
 0x1e1   : > { %v8005_v27 = vrot.slane %v6953_v59, 1  ;;  %v3683_v36 = vrot.slane %v7244_v37, 2  ;;  %v3689_v37 = vrot.slane %v7274_v63, 2  ;;  %v3699_v35 = vrot.slane %v7314_v26, 2 }
 0x1e2   : > { %v2476_v44 = vsel %vm2028_vm6, %v2473_v50, %v2475_v30  ;;  %v2478_v62 = vsel %vm2028_vm6, %v2475_v30, %v2477_v42  ;;  %v3680_v7 = vsel %vm3228_vm8, %v3677_v39, %v3679_v17  ;;  %v4521_v26 = vsel %vm1625_vm2, %v7567_v54, 0  ;;  %v8014_v30 = vld [vmem:[#allocation22_spill] sm:$0xff]  ;;  %v8015_v39 = vld [vmem:[#allocation23_spill] sm:$0xff] }
 0x1e3   : > { %v3686_v59 = vsel %vm3228_vm8, %v3683_v36, %v3685_v41 }
 0x1e5   : > { %5761 = vmatmul.mubr.msk.bf16.gmra.mrb[4].mxu1 %vm1570_vm5, %v8003_v47  ;;  %v2480_v47 = vsel %vm2028_vm6, %v2477_v42, %v8005_v27  ;;  %v8017_v42 = vld [vmem:[#allocation25_spill] sm:$0xff] }
 0x1e6   : > { %5766 = vmatprep.mubr.msk.bf16.mxu1 %vm1570_vm5, %v3670_v13  ;;  %v3682_v13 = vsel %vm3228_vm8, %v3679_v17, %v3681_v48 }
 0x1e7   : > { %5647 = vmatmul.mubr.msk.bf16.gmra.mrb[76].mxu0 %vm1570_vm5, %v8004_v23  ;;  %v3684_v23 = vsel %vm3228_vm8, %v3681_v48, %v3683_v36 }
 0x1e8   : > { %5652 = vmatprep.mubr.msk.bf16.mxu0 %vm1570_vm5, %v2470_v55 }
 0x1ed   : > { %5767 = vmatmul.mubr.msk.bf16.vlgmr.msra.gmra.mrb[8].mxu1 %vm1570_vm5, %v3672_v22 }
 0x1ee   : > { %5803 = vmatpush3.bf16.msra.mxu1 %v4207_v15  ;;  %5770 = vmatprep.mubr.msk.bf16.mxu1 %vm1570_vm5, %v3674_v28  ;;  %v8011_v28 = vld [vmem:[#allocation19_spill] sm:$0xff] }
 0x1ef   : > { %5653 = vmatmul.mubr.msk.bf16.vlgmr.msra.gmra.mrb[44].mxu0 %vm1570_vm5, %v2472_v34  ;;  %6178 = vmatprep.subr.msk.bf16.mxu1 %vm1625_vm2, %v7567_v54  ;;  %v8009_v34 = vld [vmem:[#allocation17_spill] sm:$0xff]  ;;  %v8016_v54 = vld [vmem:[#allocation24_spill] sm:$0xff] }
 0x1f0   : > { %5656 = vmatprep.mubr.msk.bf16.mxu0 %vm1570_vm5, %v2474_v9  ;;  %v8012_v9 = vld [vmem:[#allocation20_spill] sm:$0xff] }
 0x1f5   : > { %5771 = vmatmul.mubr.msk.bf16.gmra.mrb[12].mxu1 %vm1570_vm5, %v3676_v10  ;;  %v8018_v10 = vld [vmem:[#allocation26_spill] sm:$0xff] }
 0x1f6   : > { %5774 = vmatprep.mubr.msk.bf16.mxu1 %vm1570_vm5, %v3678_v40  ;;  %v4422_v40 = vld [vmem:[#allocation2 + $0x10] sm:$0x8] }
 0x1f7   : > { %5657 = vmatmul.mubr.msk.bf16.gmra.mrb[48].mxu0 %vm1570_vm5, %v2476_v44  ;;  %v8019_v44 = vld [vmem:[#allocation27_spill] sm:$0xff] }
 0x1f8   : > { %5660 = vmatprep.mubr.msk.bf16.mxu0 %vm1570_vm5, %v2478_v62  ;;  %v8020_v62 = vld [vmem:[#allocation13_spill] sm:$0xff] }
 0x1f9   : > { %v5219_v17 = vcombine.low %v4422_v40, %v8020_v62 }
 0x1fb   : > { %v4429_v48 = vrot.slane %v5219_v17, 3 }
 0x1fd   : > { %5775 = vmatmul.mubr.msk.bf16.gmra.mrb[16].mxu1 %vm1570_vm5, %v3680_v7 }
 0x1fe   : > { %5778 = vmatprep.mubr.msk.bf16.mxu1 %vm1570_vm5, %v3682_v13 }
 0x1ff   : > { %5661 = vmatmul.mubr.msk.bf16.gmra.mrb[52].mxu0 %vm1570_vm5, %v2480_v47 }
 0x200   : > { %5664 = vmatprep.mubr.msk.bf16.mxu0 %vm1570_vm5, %v7135_v11  ;;  %v3687_v11 = vrot.slane %v7260_v16, 2 }
 0x202   : > { %v3688_v57 = vsel %vm3228_vm8, %v3685_v41, %v3687_v11  ;;  %v3690_v55 = vsel %vm3228_vm8, %v3687_v11, %v3689_v37 }
 0x205   : > { %5779 = vmatmul.mubr.msk.bf16.gmra.mrb[20].mxu1 %vm1570_vm5, %v3684_v23 }
 0x206   : > { %5782 = vmatprep.mubr.msk.bf16.mxu1 %vm1570_vm5, %v3686_v59 }
 0x207   : > { %5665 = vmatmul.mubr.msk.bf16.gmra.mrb[56].mxu0 %vm1570_vm5, %v7142_v6  ;;  %v3691_v6 = vrot.slane %v7280_v53, 2  ;;  %v3697_v53 = vrot.slane %v7304_v43, 2  ;;  %v3702_v43 = vsel %vm3228_vm8, %v3699_v35, %v3701_v4 }
 0x208   : > { %5668 = vmatprep.mubr.msk.bf16.mxu0 %vm1570_vm5, %v7152_v19  ;;  %v3693_v19 = vrot.slane %v7288_v3, 2 }
 0x209   : > { %v3692_v16 = vsel %vm3228_vm8, %v3689_v37, %v3691_v6  ;;  %v3700_v50 = vsel %vm3228_vm8, %v3697_v53, %v3699_v35 }
 0x20a   : > { %v3694_v63 = vsel %vm3228_vm8, %v3691_v6, %v3693_v19 }
 0x20d   : > { %5783 = vmatmul.mubr.msk.bf16.gmra.mrb[24].mxu1 %vm1570_vm5, %v3688_v57 }
 0x20e   : > { %5786 = vmatprep.mubr.msk.bf16.mxu1 %vm1570_vm5, %v3690_v55 }
 0x20f   : > { %5669 = vmatmul.mubr.msk.bf16.gmra.mrb[60].mxu0 %vm1570_vm5, %v7162_v12  ;;  %v8007_v12 = vld [vmem:[#allocation15_spill] sm:$0xff] }
 0x210   : > { %5672 = vmatprep.mubr.msk.bf16.mxu0 %vm1570_vm5, %v7174_v58  ;;  %v3695_v58 = vrot.slane %v7294_v33, 2  ;;  %v6277_v33 = vld [vmem:[#allocation2 + $0xa0] ss:$0 sps:$4 sm:$0x33]  }
 0x211   : > { %v3703_v15 = vrot.slane %v6277_v33, 2 }
 0x212   : > { %v3696_v3 = vsel %vm3228_vm8, %v3693_v19, %v3695_v58  ;;  %v3698_v25 = vsel %vm3228_vm8, %v3695_v58, %v3697_v53 }
 0x213   : > { %v3704_v22 = vsel %vm3228_vm8, %v3701_v4, %v3703_v15  ;;  %v7783_v15 = vld [vmem:[%s7934_s5] ss:$0 sm:$0xff] }
 0x215   : > { %5787 = vmatmul.mubr.msk.bf16.gmra.mrb[28].mxu1 %vm1570_vm5, %v3692_v16 }
 0x216   : > { %5790 = vmatprep.mubr.msk.bf16.mxu1 %vm1570_vm5, %v3694_v63 }
 0x217   : > { %5673 = vmatmul.mubr.msk.bf16.gmra.mrb[64].mxu0 %vm1570_vm5, %v8006_v1 }
 0x218   : > { %5676 = vmatprep.mubr.msk.bf16.mxu0 %vm1570_vm5, %v8007_v12 }
 0x21d   : > { %5791 = vmatmul.mubr.msk.bf16.gmra.mrb[32].mxu1 %vm1570_vm5, %v3696_v3 }
 0x21e   : > { %5794 = vmatprep.mubr.msk.bf16.mxu1 %vm1570_vm5, %v3698_v25 }
 0x21f   : > { %5677 = vmatmul.mubr.msk.bf16.gmra.mrb[68].mxu0 %vm1570_vm5, %v8008_v8 }
 0x225   : > { %5795 = vmatmul.mubr.msk.bf16.gmra.mrb[0].mxu1 %vm1570_vm5, %v3700_v50 }
 0x226   : > { %5798 = vmatprep.mubr.msk.bf16.mxu1 %vm1570_vm5, %v3702_v43 }
 0x22d   : > { %5799 = vmatmul.mubr.msk.bf16.gmra.mrb[4].mxu1 %vm1570_vm5, %v3704_v22 }
 0x22e   : > { %5804 = vmatprep.mubr.msk.bf16.mxu1 %vm1570_vm5, %v8009_v34 }
 0x235   : > { %5805 = vmatmul.mubr.msk.bf16.vlgmr.msra.gmra.mrb[8].mxu1 %vm1570_vm5, %v8010_v20 }
 0x236   : > { %5841 = vmatpush3.bf16.msra.mxu1 %v4521_v26  ;;  %5808 = vmatprep.mubr.msk.bf16.mxu1 %vm1570_vm5, %v8011_v28 }
 0x23d   : > { %5809 = vmatmul.mubr.msk.bf16.gmra.mrb[12].mxu1 %vm1570_vm5, %v8012_v9 }
 0x23e   : > { %5812 = vmatprep.mubr.msk.bf16.mxu1 %vm1570_vm5, %v8013_v51 }
 0x245   : > { %5813 = vmatmul.mubr.msk.bf16.gmra.mrb[16].mxu1 %vm1570_vm5, %v8014_v30 }
 0x246   : > { %5816 = vmatprep.mubr.msk.bf16.mxu1 %vm1570_vm5, %v8015_v39 }
 0x24d   : > { %5817 = vmatmul.mubr.msk.bf16.gmra.mrb[20].mxu1 %vm1570_vm5, %v8016_v54 }
 0x24e   : > { %5820 = vmatprep.mubr.msk.bf16.mxu1 %vm1570_vm5, %v8017_v42 }
 0x255   : > { %5821 = vmatmul.mubr.msk.bf16.gmra.mrb[24].mxu1 %vm1570_vm5, %v8018_v10 }
 0x256   : > { %5824 = vmatprep.mubr.msk.bf16.mxu1 %vm1570_vm5, %v8019_v44 }
 0x25d   : > { %5825 = vmatmul.mubr.msk.bf16.gmra.mrb[28].mxu1 %vm1570_vm5, %v7339_v61  ;;  %v8021_v61 = vrot.slane %v7171_v18, 3  ;;  %v8022_v18 = vld [vmem:[#allocation28_spill] sm:$0xff] }
 0x25e   : > { %5828 = vmatprep.mubr.msk.bf16.mxu1 %vm1570_vm5, %v7346_v52 }
 0x25f   : > { %v4431_v52 = vsel %vm4428_vm10, %v4429_v48, %v8021_v61 }
 0x265   : > { %5829 = vmatmul.mubr.msk.bf16.gmra.mrb[32].mxu1 %vm1570_vm5, %v7355_v31  ;;  %v8023_v31 = vld [vmem:[#allocation29_spill] sm:$0xff] }
 0x266   : > { %5832 = vmatprep.mubr.msk.bf16.mxu1 %vm1570_vm5, %v7367_v46  ;;  %v8024_v46 = vld [vmem:[#allocation30_spill] sm:$0xff] }
 0x26d   : > { %5833 = vmatmul.mubr.msk.bf16.gmra.mrb[0].mxu1 %vm1570_vm5, %v7370_v38  ;;  %v8025_v38 = vld [vmem:[#allocation31_spill] sm:$0xff] }
 0x26e   : > { %5836 = vmatprep.mubr.msk.bf16.mxu1 %vm1570_vm5, %v7383_v60  ;;  %v8026_v60 = vld [vmem:[#allocation32_spill] sm:$0xff] }
 0x275   : > { %5837 = vmatmul.mubr.msk.bf16.gmra.mrb[4].mxu1 %vm1570_vm5, %v7392_v45 }
 0x276   : > { %5842 = vmatprep.mubr.msk.bf16.mxu1 %vm1570_vm5, %v4431_v52 }
 0x27d   : > { %5843 = vmatmul.mubr.msk.bf16.vlgmr.msra.gmra.mrb[8].mxu1 %vm1570_vm5, %v7388_v14  ;;  %v8027_v14 = vld [vmem:[#allocation33_spill] sm:$0xff] }
 0x27e   : > { %5846 = vmatprep.mubr.msk.bf16.mxu1 %vm1570_vm5, %v7395_v5 }
 0x285   : > { %5847 = vmatmul.mubr.msk.bf16.gmra.mrb[12].mxu1 %vm1570_vm5, %v7398_v0 }
 0x286   : > { %5850 = vmatprep.mubr.msk.bf16.mxu1 %vm1570_vm5, %v7401_v56 }
 0x28d   : > { %5851 = vmatmul.mubr.msk.bf16.gmra.mrb[16].mxu1 %vm1570_vm5, %v7411_v2  ;;  %v8028_v2 = vld [vmem:[#allocation34_spill] sm:$0xff] }
 0x28e   : > { %5854 = vmatprep.mubr.msk.bf16.mxu1 %vm1570_vm5, %v7426_v32 }
 0x295   : > { %5855 = vmatmul.mubr.msk.bf16.gmra.mrb[20].mxu1 %vm1570_vm5, %v7429_v49 }
 0x296   : > { %5858 = vmatprep.mubr.msk.bf16.mxu1 %vm1570_vm5, %v8022_v18 }
 0x29d   : > { %5859 = vmatmul.mubr.msk.bf16.gmra.mrb[24].mxu1 %vm1570_vm5, %v8023_v31 }
 0x29e   : > { %5862 = vmatprep.mubr.msk.bf16.mxu1 %vm1570_vm5, %v8024_v46 }
 0x2a5   : > { %5863 = vmatmul.mubr.msk.bf16.gmra.mrb[28].mxu1 %vm1570_vm5, %v8025_v38 }
 0x2a6   : > { %5866 = vmatprep.mubr.msk.bf16.mxu1 %vm1570_vm5, %v8026_v60 }
 0x2ad   : > { %5867 = vmatmul.mubr.msk.bf16.gmra.mrb[32].mxu1 %vm1570_vm5, %v8027_v14 }
 0x2ae   : > { %5870 = vmatprep.mubr.msk.bf16.mxu1 %vm1570_vm5, %v7457_v29 }
 0x2b2   : > { %v7717_v45 = vpop.f32.mrb[72].mxu0 }
 0x2b3   : > { %v7719_v5 = vpop.f32.mrb[73].mxu0 }
 0x2b4   : > { %v7721_v0 = vpop.f32.mrb[74].mxu0 }
 0x2b5   : > { %v7723_v56 = vpop.f32.mrb[75].mxu0  ;;  %5871 = vmatmul.mubr.msk.bf16.gmra.mrb[0].mxu1 %vm1570_vm5, %v7461_v24 }
 0x2b6   : > { %5874 = vmatprep.mubr.msk.bf16.mxu1 %vm1570_vm5, %v8028_v2 }
 0x2ba   : > { %v7729_v32 = vpop.f32.mrb[76].mxu0 }
 0x2bb   : > { %v7731_v49 = vpop.f32.mrb[77].mxu0 }
 0x2bc   : > { %v7733_v7 = vpop.f32.mrb[78].mxu0 }
 0x2bd   : > { %v7735_v29 = vpop.f32.mrb[79].mxu0  ;;  %5875 = vmatmul.mubr.msk.bf16.gmra.mrb[4].mxu1 %vm1570_vm5, %v7472_v21 }
 0x2c2   : > { %v5654_v27 = vpop.f32.mrb[44].mxu0 }
 0x2c3   : > { %v2596_v47 = vpop.f32.mrb[45].mxu0 }
 0x2c4   : > { %v5655_v13 = vpop.f32.mrb[46].mxu0 }
 0x2c5   : > { %v2599_v36 = vpop.f32.mrb[47].mxu0 }
 0x2ca   : > { %v5658_v41 = vpop.f32.mrb[48].mxu0 }
 0x2cb   : > { %v2612_v24 = vpop.f32.mrb[49].mxu0 }
 0x2cc   : > { %v5659_v23 = vpop.f32.mrb[50].mxu0 }
 0x2cd   : > { %v2615_v59 = vpop.f32.mrb[51].mxu0 }
 0x2d2   : > { %v7739_v11 = vpop.f32.mrb[52].mxu0 }
 0x2d3   : > { %v7741_v37 = vpop.f32.mrb[53].mxu0 }
 0x2d4   : > { %v7743_v57 = vpop.f32.mrb[54].mxu0 }
 0x2d5   : > { %v7745_v55 = vpop.f32.mrb[55].mxu0 }
 0x2da   : > { %v7747_v6 = vpop.f32.mrb[56].mxu0 }
 0x2db   : > { %v7749_v21 = vpop.f32.mrb[57].mxu0 }
 0x2dc   : > { %v7751_v19 = vpop.f32.mrb[58].mxu0 }
 0x2dd   : > { %v7753_v16 = vpop.f32.mrb[59].mxu0 }
 0x2e2   : > { %v7755_v63 = vpop.f32.mrb[60].mxu0 }
 0x2e3   : > { %v7757_v1 = vpop.f32.mrb[61].mxu0 }
 0x2e4   : > { %v7759_v12 = vpop.f32.mrb[62].mxu0 }
 0x2e5   : > { %v7761_v58 = vpop.f32.mrb[63].mxu0 }
 0x2ea   : > { %v7763_v53 = vpop.f32.mrb[64].mxu0 }
 0x2eb   : > { %v7765_v3 = vpop.f32.mrb[65].mxu0 }
 0x2ec   : > { %v7767_v25 = vpop.f32.mrb[66].mxu0 }
 0x2ed   : > { %v7769_v8 = vpop.f32.mrb[67].mxu0 }
 0x2f2   : > { %v7771_v35 = vpop.f32.mrb[68].mxu0 }
 0x2f3   : > { %v7773_v4 = vpop.f32.mrb[69].mxu0 }
 0x2f4   : > { %v7775_v50 = vpop.f32.mrb[70].mxu0 }
 0x2f5   : > { %v7777_v33 = vpop.f32.mrb[71].mxu0 }
 0x350   : > { %v5844_v43 = vpop.f32.mrb[8].mxu1 }
 0x351   : > { %v5880_v22 = vadd.f32 %v5844_v43, %v5654_v27  ;;  %v4557_v34 = vpop.f32.mrb[9].mxu1 }
 0x352   : > { %v5881_v26 = vadd.f32 %v4557_v34, %v2596_v47  ;;  %v5845_v20 = vpop.f32.mrb[10].mxu1 }
 0x353   : > { %v4745_v28 = vadd.f32 %v5880_v22, %v7783_v15  ;;  %v5882_v9 = vadd.f32 %v5845_v20, %v5655_v13  ;;  %v4560_v51 = vpop.f32.mrb[11].mxu1 }
 0x354   : > { %v4743_v30 = vadd.f32 %v5881_v26, %v7783_v15  ;;  %v5883_v39 = vadd.f32 %v4560_v51, %v2599_v36 }
 0x355   : > { %v4781_v54 = vmax.f32 %v4745_v28, 0.0  ;;  %v4746_v42 = vadd.f32 %v5882_v9, %v7783_v15 }
 0x356   : > { %v4779_v10 = vmax.f32 %v4743_v30, 0.0  ;;  %v4744_v44 = vadd.f32 %v5883_v39, %v7783_v15 }
 0x357   : > { %4817 = vst.msk [vmem:[%s7789_s19 + $0x10] sm:$0xff] %vm1570_vm5, %v4781_v54  ;;  %v4782_v40 = vmax.f32 %v4746_v42, 0.0 }
 0x358   : > { %4815 = vst.msk [vmem:[%s7789_s19] sm:$0xff] %vm1570_vm5, %v4779_v10  ;;  %v4780_v62 = vmax.f32 %v4744_v44, 0.0  ;;  %v5848_v17 = vpop.f32.mrb[12].mxu1 }
 0x359   : > { %4818 = vst.msk [vmem:[%s7789_s19 + $0x18] sm:$0xff] %vm1570_vm5, %v4782_v40  ;;  %v5884_v48 = vadd.f32 %v5848_v17, %v5658_v41  ;;  %v4573_v61 = vpop.f32.mrb[13].mxu1 }
 0x35a   : > { %4816 = vst.msk [vmem:[%s7789_s19 + $0x8] sm:$0xff] %vm1570_vm5, %v4780_v62  ;;  %v5885_v52 = vadd.f32 %v4573_v61, %v2612_v24  ;;  %v5849_v18 = vpop.f32.mrb[14].mxu1 }
 0x35b   : > { %v4749_v31 = vadd.f32 %v5884_v48, %v7783_v15  ;;  %v5886_v46 = vadd.f32 %v5849_v18, %v5659_v23  ;;  %v4576_v38 = vpop.f32.mrb[15].mxu1 }
 0x35c   : > { %v4747_v60 = vadd.f32 %v5885_v52, %v7783_v15  ;;  %v5887_v14 = vadd.f32 %v4576_v38, %v2615_v59 }
 0x35d   : > { %v4785_v2 = vmax.f32 %v4749_v31, 0.0  ;;  %v4750_v27 = vadd.f32 %v5886_v46, %v7783_v15 }
 0x35e   : > { %v4783_v47 = vmax.f32 %v4747_v60, 0.0  ;;  %v4748_v13 = vadd.f32 %v5887_v14, %v7783_v15 }
 0x35f   : > { %4821 = vst.msk [vmem:[%s7789_s19 + $0x30] sm:$0xff] %vm1570_vm5, %v4785_v2  ;;  %v4786_v36 = vmax.f32 %v4750_v27, 0.0 }
 0x360   : > { %4819 = vst.msk [vmem:[%s7789_s19 + $0x20] sm:$0xff] %vm1570_vm5, %v4783_v47  ;;  %v4784_v41 = vmax.f32 %v4748_v13, 0.0  ;;  %v5852_v24 = vpop.f32.mrb[16].mxu1 }
 0x361   : > { %4822 = vst.msk [vmem:[%s7789_s19 + $0x38] sm:$0xff] %vm1570_vm5, %v4786_v36  ;;  %v5888_v23 = vadd.f32 %v5852_v24, %v7739_v11  ;;  %v4589_v59 = vpop.f32.mrb[17].mxu1 }
 0x362   : > { %4820 = vst.msk [vmem:[%s7789_s19 + $0x28] sm:$0xff] %vm1570_vm5, %v4784_v41  ;;  %v5889_v43 = vadd.f32 %v4589_v59, %v7741_v37  ;;  %v5853_v22 = vpop.f32.mrb[18].mxu1 }
 0x363   : > { %v4753_v34 = vadd.f32 %v5888_v23, %v7783_v15  ;;  %v5890_v26 = vadd.f32 %v5853_v22, %v7743_v57  ;;  %v4592_v20 = vpop.f32.mrb[19].mxu1 }
 0x364   : > { %v4751_v28 = vadd.f32 %v5889_v43, %v7783_v15  ;;  %v5891_v9 = vadd.f32 %v4592_v20, %v7745_v55 }
 0x365   : > { %v4789_v51 = vmax.f32 %v4753_v34, 0.0  ;;  %v4754_v11 = vadd.f32 %v5890_v26, %v7783_v15 }
 0x366   : > { %v4787_v30 = vmax.f32 %v4751_v28, 0.0  ;;  %v4752_v39 = vadd.f32 %v5891_v9, %v7783_v15 }
 0x367   : > { %4825 = vst.msk [vmem:[%s7789_s19 + $0x50] sm:$0xff] %vm1570_vm5, %v4789_v51  ;;  %v4790_v37 = vmax.f32 %v4754_v11, 0.0 }
 0x368   : > { %4823 = vst.msk [vmem:[%s7789_s19 + $0x40] sm:$0xff] %vm1570_vm5, %v4787_v30  ;;  %v4788_v54 = vmax.f32 %v4752_v39, 0.0  ;;  %v5856_v42 = vpop.f32.mrb[20].mxu1 }
 0x369   : > { %4826 = vst.msk [vmem:[%s7789_s19 + $0x58] sm:$0xff] %vm1570_vm5, %v4790_v37  ;;  %v5892_v57 = vadd.f32 %v5856_v42, %v7747_v6  ;;  %v4605_v55 = vpop.f32.mrb[21].mxu1 }
 0x36a   : > { %4824 = vst.msk [vmem:[%s7789_s19 + $0x48] sm:$0xff] %vm1570_vm5, %v4788_v54  ;;  %v5893_v10 = vadd.f32 %v4605_v55, %v7749_v21  ;;  %v5857_v44 = vpop.f32.mrb[22].mxu1 }
 0x36b   : > { %v4757_v40 = vadd.f32 %v5892_v57, %v7783_v15  ;;  %v5894_v62 = vadd.f32 %v5857_v44, %v7751_v19  ;;  %v4608_v17 = vpop.f32.mrb[23].mxu1 }
 0x36c   : > { %v4755_v48 = vadd.f32 %v5893_v10, %v7783_v15  ;;  %v5895_v61 = vadd.f32 %v4608_v17, %v7753_v16 }
 0x36d   : > { %v4793_v52 = vmax.f32 %v4757_v40, 0.0  ;;  %v4758_v6 = vadd.f32 %v5894_v62, %v7783_v15 }
 0x36e   : > { %v4791_v18 = vmax.f32 %v4755_v48, 0.0  ;;  %v4756_v31 = vadd.f32 %v5895_v61, %v7783_v15 }
 0x36f   : > { %4829 = vst.msk [vmem:[%s7789_s19 + $0x70] sm:$0xff] %vm1570_vm5, %v4793_v52  ;;  %v4794_v21 = vmax.f32 %v4758_v6, 0.0 }
 0x370   : > { %4827 = vst.msk [vmem:[%s7789_s19 + $0x60] sm:$0xff] %vm1570_vm5, %v4791_v18  ;;  %v4792_v46 = vmax.f32 %v4756_v31, 0.0  ;;  %v5860_v38 = vpop.f32.mrb[24].mxu1 }
 0x371   : > { %4830 = vst.msk [vmem:[%s7789_s19 + $0x78] sm:$0xff] %vm1570_vm5, %v4794_v21  ;;  %v5896_v19 = vadd.f32 %v5860_v38, %v7755_v63  ;;  %v4621_v16 = vpop.f32.mrb[25].mxu1 }
 0x372   : > { %4828 = vst.msk [vmem:[%s7789_s19 + $0x68] sm:$0xff] %vm1570_vm5, %v4792_v46  ;;  %v5897_v60 = vadd.f32 %v4621_v16, %v7757_v1  ;;  %v5861_v14 = vpop.f32.mrb[26].mxu1 }
 0x373   : > { %v4761_v2 = vadd.f32 %v5896_v19, %v7783_v15  ;;  %v5898_v27 = vadd.f32 %v5861_v14, %v7759_v12  ;;  %v4624_v47 = vpop.f32.mrb[27].mxu1 }
 0x374   : > { %v4759_v13 = vadd.f32 %v5897_v60, %v7783_v15  ;;  %v5899_v36 = vadd.f32 %v4624_v47, %v7761_v58 }
 0x375   : > { %v4797_v41 = vmax.f32 %v4761_v2, 0.0  ;;  %v4762_v63 = vadd.f32 %v5898_v27, %v7783_v15 }
 0x376   : > { %v4795_v24 = vmax.f32 %v4759_v13, 0.0  ;;  %v4760_v23 = vadd.f32 %v5899_v36, %v7783_v15 }
 0x377   : > { %4833 = vst.msk [vmem:[%s7789_s19 + $0x90] sm:$0xff] %vm1570_vm5, %v4797_v41  ;;  %v4798_v1 = vmax.f32 %v4762_v63, 0.0 }
 0x378   : > { %4831 = vst.msk [vmem:[%s7789_s19 + $0x80] sm:$0xff] %vm1570_vm5, %v4795_v24  ;;  %v4796_v59 = vmax.f32 %v4760_v23, 0.0  ;;  %v5864_v43 = vpop.f32.mrb[28].mxu1 }
 0x379   : > { %4834 = vst.msk [vmem:[%s7789_s19 + $0x98] sm:$0xff] %vm1570_vm5, %v4798_v1  ;;  %v5900_v12 = vadd.f32 %v5864_v43, %v7763_v53  ;;  %v4637_v58 = vpop.f32.mrb[29].mxu1 }
 0x37a   : > { %4832 = vst.msk [vmem:[%s7789_s19 + $0x88] sm:$0xff] %vm1570_vm5, %v4796_v59  ;;  %v5901_v22 = vadd.f32 %v4637_v58, %v7765_v3  ;;  %v5865_v34 = vpop.f32.mrb[30].mxu1 }
 0x37b   : > { %v4765_v26 = vadd.f32 %v5900_v12, %v7783_v15  ;;  %v5902_v20 = vadd.f32 %v5865_v34, %v7767_v25  ;;  %v4640_v28 = vpop.f32.mrb[31].mxu1 }
 0x37c   : > { %v4763_v9 = vadd.f32 %v5901_v22, %v7783_v15  ;;  %v5903_v51 = vadd.f32 %v4640_v28, %v7769_v8 }
 0x37d   : > { %v4801_v11 = vmax.f32 %v4765_v26, 0.0  ;;  %v4766_v53 = vadd.f32 %v5902_v20, %v7783_v15 }
 0x37e   : > { %v4799_v30 = vmax.f32 %v4763_v9, 0.0  ;;  %v4764_v39 = vadd.f32 %v5903_v51, %v7783_v15 }
 0x37f   : > { %4837 = vst.msk [vmem:[%s7789_s19 + $0xb0] sm:$0xff] %vm1570_vm5, %v4801_v11  ;;  %v4802_v3 = vmax.f32 %v4766_v53, 0.0 }
 0x380   : > { %4835 = vst.msk [vmem:[%s7789_s19 + $0xa0] sm:$0xff] %vm1570_vm5, %v4799_v30  ;;  %v4800_v37 = vmax.f32 %v4764_v39, 0.0  ;;  %v5868_v54 = vpop.f32.mrb[32].mxu1 }
 0x381   : > { %4838 = vst.msk [vmem:[%s7789_s19 + $0xb8] sm:$0xff] %vm1570_vm5, %v4802_v3  ;;  %v5904_v25 = vadd.f32 %v5868_v54, %v7771_v35  ;;  %v4653_v8 = vpop.f32.mrb[33].mxu1 }
 0x382   : > { %4836 = vst.msk [vmem:[%s7789_s19 + $0xa8] sm:$0xff] %vm1570_vm5, %v4800_v37  ;;  %v5905_v42 = vadd.f32 %v4653_v8, %v7773_v4  ;;  %v5869_v57 = vpop.f32.mrb[34].mxu1 }
 0x383   : > { %v4769_v55 = vadd.f32 %v5904_v25, %v7783_v15  ;;  %v5906_v10 = vadd.f32 %v5869_v57, %v7775_v50  ;;  %v4656_v44 = vpop.f32.mrb[35].mxu1 }
 0x384   : > { %v4767_v40 = vadd.f32 %v5905_v42, %v7783_v15  ;;  %v5907_v62 = vadd.f32 %v4656_v44, %v7777_v33 }
 0x385   : > { %v4805_v17 = vmax.f32 %v4769_v55, 0.0  ;;  %v4770_v35 = vadd.f32 %v5906_v10, %v7783_v15 }
 0x386   : > { %v4803_v48 = vmax.f32 %v4767_v40, 0.0  ;;  %v4768_v61 = vadd.f32 %v5907_v62, %v7783_v15 }
 0x387   : > { %4841 = vst.msk [vmem:[%s7789_s19 + $0xd0] sm:$0xff] %vm1570_vm5, %v4805_v17  ;;  %v4806_v4 = vmax.f32 %v4770_v35, 0.0 }
 0x388   : > { %4839 = vst.msk [vmem:[%s7789_s19 + $0xc0] sm:$0xff] %vm1570_vm5, %v4803_v48  ;;  %v4804_v52 = vmax.f32 %v4768_v61, 0.0  ;;  %v5872_v6 = vpop.f32.mrb[0].mxu1 }
 0x389   : > { %4842 = vst.msk [vmem:[%s7789_s19 + $0xd8] sm:$0xff] %vm1570_vm5, %v4806_v4  ;;  %v5908_v50 = vadd.f32 %v5872_v6, %v7717_v45  ;;  %v4669_v33 = vpop.f32.mrb[1].mxu1 }
 0x38a   : > { %4840 = vst.msk [vmem:[%s7789_s19 + $0xc8] sm:$0xff] %vm1570_vm5, %v4804_v52  ;;  %v5909_v18 = vadd.f32 %v4669_v33, %v7719_v5  ;;  %v5873_v31 = vpop.f32.mrb[2].mxu1 }
 0x38b   : > { %v4773_v21 = vadd.f32 %v5908_v50, %v7783_v15  ;;  %v5910_v46 = vadd.f32 %v5873_v31, %v7721_v0  ;;  %v4672_v38 = vpop.f32.mrb[3].mxu1 }
 0x38c   : > { %v4771_v19 = vadd.f32 %v5909_v18, %v7783_v15  ;;  %v5911_v16 = vadd.f32 %v4672_v38, %v7723_v56 }
 0x38d   : > { %v4809_v60 = vmax.f32 %v4773_v21, 0.0  ;;  %v4774_v45 = vadd.f32 %v5910_v46, %v7783_v15 }
 0x38e   : > { %v4807_v14 = vmax.f32 %v4771_v19, 0.0  ;;  %v4772_v2 = vadd.f32 %v5911_v16, %v7783_v15 }
 0x38f   : > { %4845 = vst.msk [vmem:[%s7789_s19 + $0xf0] sm:$0xff] %vm1570_vm5, %v4809_v60  ;;  %v4810_v5 = vmax.f32 %v4774_v45, 0.0 }
 0x390   : > { %4843 = vst.msk [vmem:[%s7789_s19 + $0xe0] sm:$0xff] %vm1570_vm5, %v4807_v14  ;;  %v4808_v27 = vmax.f32 %v4772_v2, 0.0  ;;  %v5876_v47 = vpop.f32.mrb[4].mxu1 }
 0x391   : > { %4846 = vst.msk [vmem:[%s7789_s19 + $0xf8] sm:$0xff] %vm1570_vm5, %v4810_v5  ;;  %v5912_v0 = vadd.f32 %v5876_v47, %v7729_v32  ;;  %v4685_v56 = vpop.f32.mrb[5].mxu1 }
 0x392   : > { %4844 = vst.msk [vmem:[%s7789_s19 + $0xe8] sm:$0xff] %vm1570_vm5, %v4808_v27  ;;  %v5913_v13 = vadd.f32 %v4685_v56, %v7731_v49  ;;  %v5877_v36 = vpop.f32.mrb[6].mxu1 }
 0x393   : > { %v4777_v41 = vadd.f32 %v5912_v0, %v7783_v15  ;;  %v5914_v63 = vadd.f32 %v5877_v36, %v7733_v7  ;;  %v4688_v24 = vpop.f32.mrb[7].mxu1 }
 0x394   : > { %v4775_v23 = vadd.f32 %v5913_v13, %v7783_v15  ;;  %v5915_v1 = vadd.f32 %v4688_v24, %v7735_v29 }
 0x395   : > { %v4813_v59 = vmax.f32 %v4777_v41, 0.0  ;;  %v4778_v32 = vadd.f32 %v5914_v63, %v7783_v15 }
 0x396   : > { %v4811_v43 = vmax.f32 %v4775_v23, 0.0  ;;  %v4776_v12 = vadd.f32 %v5915_v1, %v7783_v15 }
 0x397   : > { %4849 = vst.msk [vmem:[%s7789_s19 + $0x110] sm:$0xff] %vm1570_vm5, %v4813_v59  ;;  %v4814_v49 = vmax.f32 %v4778_v32, 0.0 }
 0x398   : > { %4847 = vst.msk [vmem:[%s7789_s19 + $0x100] sm:$0xff] %vm1570_vm5, %v4811_v43  ;;  %v4812_v58 = vmax.f32 %v4776_v12, 0.0 }
 0x399   : > { %4850 = vst.msk [vmem:[%s7789_s19 + $0x118] sm:$0xff] %vm1570_vm5, %v4814_v49 }
 0x39a   : > { %4848 = vst.msk [vmem:[%s7789_s19 + $0x108] sm:$0xff] %vm1570_vm5, %v4812_v58 }
 0x39b PF: > { %s16_s21 = sadd.s32 1, %s6307_s21  }
 0x39c   : > { %p13_p4 = scmp.ge.s32.totalorder %s16_s21, 4  }
 0x39e   :  { %15 = sbr.rel (!%p13_p4) target bundleno = 1 (0x1), region = 82 }

</bundles_post_ra>
